<compile_context>
chip_gen: v5e
topology: v5e:2x2
jax: 0.10.0
libtpu: 0.0.40
codegen_flags: <defaults>
</compile_context>

<pallas_src>
import functools

import jax
import jax.numpy as jnp
import numpy as np
from jax.experimental import pallas as pl
from jax.experimental.pallas import tpu as pltpu

EPS = 1e-6
_SQRT1_2 = 0.7071067811865476


def _gelu(x):
    # nn.GELU() default = exact (erf) GELU.
    return 0.5 * x * (1.0 + jax.lax.erf(x * _SQRT1_2))


def _layernorm_ref(x, w, b, eps=EPS):
    # Matches the custom PyTorch LayerNorm: unbiased std (correction=1) and
    # eps added to std (not to variance).
    d = x.shape[-1]
    mean = jnp.mean(x, axis=-1, keepdims=True)
    xc = x - mean
    var = jnp.sum(xc * xc, axis=-1, keepdims=True) / (d - 1)
    return w * xc / (jnp.sqrt(var) + eps) + b


def _layernorm_k(x, w, b, eps=EPS):
    # Same math, but the divide goes through the EUP via pl.reciprocal.
    d = x.shape[-1]
    mean = jnp.mean(x, axis=-1, keepdims=True)
    xc = x - mean
    var = jnp.sum(xc * xc, axis=-1, keepdims=True) * (1.0 / (d - 1))
    inv = pl.reciprocal(jnp.sqrt(var) + eps, approx=True)
    return (xc * inv) * w + b


def poolformer_kernel(x_ref, w_init_ref, b_init_ref,
                      w_ne1_ref, b_ne1_ref, w_ne2_ref, b_ne2_ref,
                      n1w_ref, n1b_ref, n2w_ref, n2b_ref,
                      fc1w_ref, fc1b_ref, fc2w_ref, fc2b_ref,
                      normw_ref, normb_ref, o_ref):
    d = pl.program_id(1)
    n_layers = pl.num_programs(1)
    bt, n, dim = o_ref.shape
    rows = bt * n

    # ---- prologue (once per batch block): node_init (+depot) + node_embedding
    @pl.when(d == 0)
    def _prologue():
        x = x_ref[...].reshape(rows, x_ref.shape[-1])
        w0 = w_init_ref[...]
        h = jnp.dot(x.astype(w0.dtype), w0,
                    preferred_element_type=jnp.float32) + b_init_ref[...]
        # depot-token add is already folded into w_init via the indicator col.
        w1 = w_ne1_ref[...]
        h = jnp.dot(h.astype(w1.dtype), w1,
                    preferred_element_type=jnp.float32) + b_ne1_ref[...]
        h = jnp.maximum(h, 0.0)
        w2 = w_ne2_ref[...]
        h = jnp.dot(h.astype(w2.dtype), w2,
                    preferred_element_type=jnp.float32) + b_ne2_ref[...]
        o_ref[...] = h.reshape(bt, n, dim)

    # ---- PoolFormer block `d` (only this layer's weights are in VMEM) -------
    h = o_ref[...].reshape(rows, dim)

    v1 = _layernorm_k(h, n1w_ref[0], n1b_ref[0])
    # token-mixer pooling must stay per-sample: reduce over axis=1 of (bt,n,dim)
    pooled = jnp.mean(v1.reshape(bt, n, dim), axis=1, keepdims=True)
    h = (h.reshape(bt, n, dim) + pooled).reshape(rows, dim)

    v2 = _layernorm_k(h, n2w_ref[0], n2b_ref[0])
    fw1 = fc1w_ref[0]
    z = jnp.dot(v2.astype(fw1.dtype), fw1,
                preferred_element_type=jnp.float32) + fc1b_ref[0]
    z = _gelu(z)
    fw2 = fc2w_ref[0]
    z = jnp.dot(z.astype(fw2.dtype), fw2,
                preferred_element_type=jnp.float32) + fc2b_ref[0]
    h = h + z

    @pl.when(d < n_layers - 1)
    def _store():
        o_ref[...] = h.reshape(bt, n, dim)

    # ---- epilogue (last layer): final LayerNorm -----------------------------
    @pl.when(d == n_layers - 1)
    def _epilogue():
        o_ref[...] = _layernorm_k(
            h, normw_ref[...], normb_ref[...]).reshape(bt, n, dim)


def _choose_block_b(batch, n_tokens, target_rows=256, max_rows=4096):
    """Divisor of `batch`: smallest one whose row count fills MXU/lane tiles
    (>= target_rows), capped so the activation tile stays VMEM-friendly."""
    best = 1
    for bt in range(1, batch + 1):
        if batch % bt:
            continue
        if bt * n_tokens <= max_rows:
            best = bt
        if bt * n_tokens >= target_rows:
            break
    return best


def poolformer_forward(x, params, depth, *, block_b=None,
                       weight_dtype=jnp.float32, interpret=False):
    B, N, IN = x.shape
    D = params["w_init"].shape[1]
    H = params["w_ne1"].shape[1]
    assert depth >= 1 and params["fc1w"].shape[0] == depth

    if block_b is None:
        block_b = _choose_block_b(B, N)
    assert B % block_b == 0, (B, block_b)
    n_blocks = B // block_b

    # Fold the depot-token add into node_init: append an "is token 0"
    # indicator feature to x and the depot row to w_init.
    ind = jnp.zeros((B, N, 1), x.dtype).at[:, 0, 0].set(1.0)
    x_aug = jnp.concatenate([x, ind], axis=-1)                       # (B,N,IN+1)
    w_init_aug = jnp.concatenate([params["w_init"], params["depot"]], axis=0)

    wd = weight_dtype
    per_layer_vec = lambda a: a.reshape(depth, 1, a.shape[-1])
    inputs = [
        x_aug,
        # prologue / epilogue params (block index constant across the grid)
        w_init_aug, params["b_init"],
        params["w_ne1"].astype(wd), params["b_ne1"],
        params["w_ne2"].astype(wd), params["b_ne2"],
        # per-layer params (streamed one layer per depth step)
        per_layer_vec(params["n1w"]), per_layer_vec(params["n1b"]),
        per_layer_vec(params["n2w"]), per_layer_vec(params["n2b"]),
        params["fc1w"].astype(wd), per_layer_vec(params["fc1b"]),
        params["fc2w"].astype(wd), per_layer_vec(params["fc2b"]),
        params["normw"], params["normb"],
    ]

    def const_spec(a):
        # Constant block index -> fetched once, stays resident in VMEM.
        # TODO(synk): request single-buffering (pl.Buffered(1)) for these
        # grid-invariant weights once supported to reclaim the 2nd buffer.
        return pl.BlockSpec(a.shape, lambda b, d: (0,) * a.ndim)

    def layer_spec(a):
        return pl.BlockSpec((1,) + a.shape[1:],
                            lambda b, d: (d,) + (0,) * (a.ndim - 1))

    in_specs = [pl.BlockSpec((block_b, N, IN + 1), lambda b, d: (b, 0, 0))]
    in_specs += [const_spec(a) for a in inputs[1:7]]
    in_specs += [layer_spec(a) for a in inputs[7:15]]
    in_specs += [const_spec(a) for a in inputs[15:]]

    # Same output block index across the depth axis -> `h` stays resident in
    # VMEM for the whole depth loop (accumulator pattern), one HBM writeback
    # per batch block.
    out_spec = pl.BlockSpec((block_b, N, D), lambda b, d: (b, 0, 0))

    rows = B * N
    flops = 2 * rows * ((IN + 1) * D + 2 * D * H) + depth * 4 * rows * D * H
    transcendentals = depth * rows * H + (2 * depth + 1) * rows
    bytes_accessed = int(
        x_aug.size * x_aug.dtype.itemsize
        + sum(int(np.prod(a.shape)) * a.dtype.itemsize for a in inputs[1:])
        + B * N * D * 4)

    return pl.pallas_call(
        poolformer_kernel,
        out_shape=jax.ShapeDtypeStruct((B, N, D), jnp.float32),
        grid=(n_blocks, depth),
        in_specs=in_specs,
        out_specs=out_spec,
        compiler_params=pltpu.CompilerParams(
            dimension_semantics=("parallel", "arbitrary")),
        cost_estimate=pl.CostEstimate(flops=flops,
                                      transcendentals=transcendentals,
                                      bytes_accessed=bytes_accessed),
        interpret=interpret,
    )(*inputs)


def reference_forward(x, p, depth):
    """Pure-JAX reference identical to the PyTorch forward semantics."""
    h = x @ p["w_init"] + p["b_init"]
    h = h.at[:, 0, :].add(p["depot"][0])
    h = jnp.maximum(h @ p["w_ne1"] + p["b_ne1"], 0.0) @ p["w_ne2"] + p["b_ne2"]
    for d in range(depth):
        v1 = _layernorm_ref(h, p["n1w"][d], p["n1b"][d])
        h = h + jnp.mean(v1, axis=1, keepdims=True)
        v2 = _layernorm_ref(h, p["n2w"][d], p["n2b"][d])
        z = _gelu(v2 @ p["fc1w"][d] + p["fc1b"][d])
        h = h + z @ p["fc2w"][d] + p["fc2b"][d]
    return _layernorm_ref(h, p["normw"][0], p["normb"][0])


def init_params(key, input_dim, embed_dim, depth):
    H = embed_dim * 4
    ks = jax.random.split(key, 11)
    norm01 = lambda k, shp: (jax.random.normal(k, shp, jnp.float32) * 0.1)
    return {
        "w_init": norm01(ks[0], (input_dim, embed_dim)),
        "b_init": norm01(ks[1], (1, embed_dim)),
        "depot":  jax.random.normal(ks[2], (1, embed_dim), jnp.float32),
        "w_ne1":  norm01(ks[3], (embed_dim, H)),
        "b_ne1":  norm01(ks[4], (1, H)),
        "w_ne2":  norm01(ks[5], (H, embed_dim)),
        "b_ne2":  norm01(ks[6], (1, embed_dim)),
        # LayerNorm params initialized as in the module (ones / zeros)
        "n1w": jnp.ones((depth, embed_dim), jnp.float32),
        "n1b": jnp.zeros((depth, embed_dim), jnp.float32),
        "n2w": jnp.ones((depth, embed_dim), jnp.float32),
        "n2b": jnp.zeros((depth, embed_dim), jnp.float32),
        "fc1w": norm01(ks[7], (depth, embed_dim, H)),
        "fc1b": norm01(ks[8], (depth, H)),
        "fc2w": norm01(ks[9], (depth, H, embed_dim)),
        "fc2b": norm01(ks[10], (depth, embed_dim)),
        "normw": jnp.ones((1, embed_dim), jnp.float32),
        "normb": jnp.zeros((1, embed_dim), jnp.float32),
    }


if __name__ == "__main__":
    # Small shapes consistent with the module: (batch, nodes, input_dim=3),
    # embed_dim=128 (module default) -> lane-dense (rows, 128) output tiles.
    B, N, IN, D, DEPTH = 4, 8, 3, 128, 2
    key = jax.random.PRNGKey(0)
    kp, kx = jax.random.split(key)
    params = init_params(kp, IN, D, DEPTH)
    x = jax.random.normal(kx, (B, N, IN), jnp.float32)

    # block_b=2 -> 2 batch blocks on the "parallel" axis (both v7x TCs used).
    fwd = jax.jit(functools.partial(poolformer_forward, depth=DEPTH, block_b=2))
    out = jax.block_until_ready(fwd(x, params))

    ref = reference_forward(x, params, DEPTH)
    # approx-reciprocal LayerNorm => slightly looser tolerance than exact f32.
    np.testing.assert_allclose(np.asarray(out), np.asarray(ref),
                               rtol=1e-2, atol=1e-2)
    print("KERNEL_OK")
</pallas_src>

<mosaic_0001>
module attributes {stable_mosaic.version = 11 : i64} {
  func.func @poolformer_kernel(%arg0: i32, %arg1: i32, %arg2: memref<2x8x4xf32, #tpu.memory_space<vmem>>, %arg3: memref<4x128xf32, #tpu.memory_space<vmem>>, %arg4: memref<1x128xf32, #tpu.memory_space<vmem>>, %arg5: memref<128x512xf32, #tpu.memory_space<vmem>>, %arg6: memref<1x512xf32, #tpu.memory_space<vmem>>, %arg7: memref<512x128xf32, #tpu.memory_space<vmem>>, %arg8: memref<1x128xf32, #tpu.memory_space<vmem>>, %arg9: memref<1x1x128xf32, #tpu.memory_space<vmem>>, %arg10: memref<1x1x128xf32, #tpu.memory_space<vmem>>, %arg11: memref<1x1x128xf32, #tpu.memory_space<vmem>>, %arg12: memref<1x1x128xf32, #tpu.memory_space<vmem>>, %arg13: memref<1x128x512xf32, #tpu.memory_space<vmem>>, %arg14: memref<1x1x512xf32, #tpu.memory_space<vmem>>, %arg15: memref<1x512x128xf32, #tpu.memory_space<vmem>>, %arg16: memref<1x1x128xf32, #tpu.memory_space<vmem>>, %arg17: memref<1x128xf32, #tpu.memory_space<vmem>>, %arg18: memref<1x128xf32, #tpu.memory_space<vmem>>, %arg19: memref<2x8x128xf32, #tpu.memory_space<vmem>>) attributes {dimension_semantics = [#tpu.dimension_semantics<parallel>, #tpu.dimension_semantics<arbitrary>], iteration_bounds = array<i64: 2, 2>, scalar_prefetch = 0 : i64, scratch_operands = 0 : i64, tpu.core_type = #tpu.core_type<tc>, window_params = [{transform_indices = @transform_0, window_bounds = array<i64: 2, 8, 4>}, {pipeline_mode = #tpu.pipeline_mode<synchronous>, transform_indices = @transform_1, window_bounds = array<i64: 4, 128>}, {pipeline_mode = #tpu.pipeline_mode<synchronous>, transform_indices = @transform_2, window_bounds = array<i64: 1, 128>}, {pipeline_mode = #tpu.pipeline_mode<synchronous>, transform_indices = @transform_3, window_bounds = array<i64: 128, 512>}, {pipeline_mode = #tpu.pipeline_mode<synchronous>, transform_indices = @transform_4, window_bounds = array<i64: 1, 512>}, {pipeline_mode = #tpu.pipeline_mode<synchronous>, transform_indices = @transform_5, window_bounds = array<i64: 512, 128>}, {pipeline_mode = #tpu.pipeline_mode<synchronous>, transform_indices = @transform_6, window_bounds = array<i64: 1, 128>}, {transform_indices = @transform_7, window_bounds = array<i64: 1, 1, 128>}, {transform_indices = @transform_8, window_bounds = array<i64: 1, 1, 128>}, {transform_indices = @transform_9, window_bounds = array<i64: 1, 1, 128>}, {transform_indices = @transform_10, window_bounds = array<i64: 1, 1, 128>}, {transform_indices = @transform_11, window_bounds = array<i64: 1, 128, 512>}, {transform_indices = @transform_12, window_bounds = array<i64: 1, 1, 512>}, {transform_indices = @transform_13, window_bounds = array<i64: 1, 512, 128>}, {transform_indices = @transform_14, window_bounds = array<i64: 1, 1, 128>}, {pipeline_mode = #tpu.pipeline_mode<synchronous>, transform_indices = @transform_15, window_bounds = array<i64: 1, 128>}, {pipeline_mode = #tpu.pipeline_mode<synchronous>, transform_indices = @transform_16, window_bounds = array<i64: 1, 128>}, {transform_indices = @transform_17, window_bounds = array<i64: 2, 8, 128>}]} {
    %c0_i32 = arith.constant 0 : i32
    %0 = arith.cmpi eq, %arg1, %c0_i32 : i32
    %1 = arith.extui %0 : i1 to i32
    %c0_i32_0 = arith.constant 0 : i32
    %2 = arith.cmpi ne, %1, %c0_i32_0 : i32
    scf.if %2 {
      %c0_46 = arith.constant 0 : index
      %c0_47 = arith.constant 0 : index
      %c0_48 = arith.constant 0 : index
      %93 = vector.load %arg2[%c0_46, %c0_47, %c0_48] : memref<2x8x4xf32, #tpu.memory_space<vmem>>, vector<2x8x4xf32>
      %94 = vector.shape_cast %93 : vector<2x8x4xf32> to vector<16x4xf32>
      %c0_49 = arith.constant 0 : index
      %c0_50 = arith.constant 0 : index
      %95 = vector.load %arg3[%c0_49, %c0_50] : memref<4x128xf32, #tpu.memory_space<vmem>>, vector<4x128xf32>
      %cst_51 = arith.constant dense<0.000000e+00> : vector<16x128xf32>
      %96 = tpu.matmul %94, %95, %cst_51 {dimension_numbers = #tpu.dot_dimension_numbers<[1], [0], [0], [1], [0, 0, 1, 1], [], []>} : vector<16x4xf32>, vector<4x128xf32>, vector<16x128xf32> -> vector<16x128xf32>
      %c0_52 = arith.constant 0 : index
      %c0_53 = arith.constant 0 : index
      %97 = vector.load %arg4[%c0_52, %c0_53] : memref<1x128xf32, #tpu.memory_space<vmem>>, vector<1x128xf32>
      %98 = vector.broadcast %97 : vector<1x128xf32> to vector<16x128xf32>
      %99 = arith.addf %96, %98 : vector<16x128xf32>
      %c0_54 = arith.constant 0 : index
      %c0_55 = arith.constant 0 : index
      %100 = vector.load %arg5[%c0_54, %c0_55] : memref<128x512xf32, #tpu.memory_space<vmem>>, vector<128x512xf32>
      %cst_56 = arith.constant dense<0.000000e+00> : vector<16x512xf32>
      %101 = tpu.matmul %99, %100, %cst_56 {dimension_numbers = #tpu.dot_dimension_numbers<[1], [0], [0], [1], [0, 0, 1, 1], [], []>} : vector<16x128xf32>, vector<128x512xf32>, vector<16x512xf32> -> vector<16x512xf32>
      %c0_57 = arith.constant 0 : index
      %c0_58 = arith.constant 0 : index
      %102 = vector.load %arg6[%c0_57, %c0_58] : memref<1x512xf32, #tpu.memory_space<vmem>>, vector<1x512xf32>
      %103 = vector.broadcast %102 : vector<1x512xf32> to vector<16x512xf32>
      %104 = arith.addf %101, %103 : vector<16x512xf32>
      %cst_59 = arith.constant 0.000000e+00 : f32
      %105 = vector.broadcast %cst_59 : f32 to vector<16x512xf32>
      %106 = arith.maximumf %104, %105 : vector<16x512xf32>
      %c0_60 = arith.constant 0 : index
      %c0_61 = arith.constant 0 : index
      %107 = vector.load %arg7[%c0_60, %c0_61] : memref<512x128xf32, #tpu.memory_space<vmem>>, vector<512x128xf32>
      %cst_62 = arith.constant dense<0.000000e+00> : vector<16x128xf32>
      %108 = tpu.matmul %106, %107, %cst_62 {dimension_numbers = #tpu.dot_dimension_numbers<[1], [0], [0], [1], [0, 0, 1, 1], [], []>} : vector<16x512xf32>, vector<512x128xf32>, vector<16x128xf32> -> vector<16x128xf32>
      %c0_63 = arith.constant 0 : index
      %c0_64 = arith.constant 0 : index
      %109 = vector.load %arg8[%c0_63, %c0_64] : memref<1x128xf32, #tpu.memory_space<vmem>>, vector<1x128xf32>
      %110 = vector.broadcast %109 : vector<1x128xf32> to vector<16x128xf32>
      %111 = arith.addf %108, %110 : vector<16x128xf32>
      %112 = vector.shape_cast %111 : vector<16x128xf32> to vector<2x8x128xf32>
      %c0_65 = arith.constant 0 : index
      %c0_66 = arith.constant 0 : index
      %c0_67 = arith.constant 0 : index
      %113 = vector.load %arg19[%c0_65, %c0_66, %c0_67] : memref<2x8x128xf32, #tpu.memory_space<vmem>>, vector<2x8x128xf32>
      tpu.vector_store %arg19[%c0_65, %c0_66, %c0_67], %112 {strides = array<i32>} : memref<2x8x128xf32, #tpu.memory_space<vmem>>, vector<2x8x128xf32>,
    } else {
    }
    %c0 = arith.constant 0 : index
    %c0_1 = arith.constant 0 : index
    %c0_2 = arith.constant 0 : index
    %3 = vector.load %arg19[%c0, %c0_1, %c0_2] : memref<2x8x128xf32, #tpu.memory_space<vmem>>, vector<2x8x128xf32>
    %4 = vector.shape_cast %3 : vector<2x8x128xf32> to vector<16x128xf32>
    %c0_3 = arith.constant 0 : index
    %c0_4 = arith.constant 0 : index
    %c0_5 = arith.constant 0 : index
    %5 = vector.load %arg9[%c0_3, %c0_4, %c0_5] : memref<1x1x128xf32, #tpu.memory_space<vmem>>, vector<1x1x128xf32>
    %6 = vector.shape_cast %5 : vector<1x1x128xf32> to vector<1x128xf32>
    %c0_6 = arith.constant 0 : index
    %c0_7 = arith.constant 0 : index
    %c0_8 = arith.constant 0 : index
    %7 = vector.load %arg10[%c0_6, %c0_7, %c0_8] : memref<1x1x128xf32, #tpu.memory_space<vmem>>, vector<1x1x128xf32>
    %8 = vector.shape_cast %7 : vector<1x1x128xf32> to vector<1x128xf32>
    %cst = arith.constant dense<0.000000e+00> : vector<16xf32>
    %9 = vector.multi_reduction <add>, %4, %cst [1] : vector<16x128xf32> to vector<16xf32>
    %10 = vector.shape_cast %9 : vector<16xf32> to vector<16x1xf32>
    %cst_9 = arith.constant 1.280000e+02 : f32
    %11 = vector.broadcast %cst_9 : f32 to vector<16x1xf32>
    %12 = arith.divf %10, %11 : vector<16x1xf32>
    %13 = vector.broadcast %12 : vector<16x1xf32> to vector<16x128xf32>
    %14 = arith.subf %4, %13 : vector<16x128xf32>
    %15 = arith.mulf %14, %14 : vector<16x128xf32>
    %cst_10 = arith.constant dense<0.000000e+00> : vector<16xf32>
    %16 = vector.multi_reduction <add>, %15, %cst_10 [1] : vector<16x128xf32> to vector<16xf32>
    %17 = vector.shape_cast %16 : vector<16xf32> to vector<16x1xf32>
    %cst_11 = arith.constant 0.00787401571 : f32
    %18 = vector.broadcast %cst_11 : f32 to vector<16x1xf32>
    %19 = arith.mulf %17, %18 : vector<16x1xf32>
    %20 = math.sqrt %19 : vector<16x1xf32>
    %cst_12 = arith.constant 9.99999997E-7 : f32
    %21 = vector.broadcast %cst_12 : f32 to vector<16x1xf32>
    %22 = arith.addf %20, %21 : vector<16x1xf32>
    %23 = tpu.reciprocal %22 {approx = true} : vector<16x1xf32> -> vector<16x1xf32>
    %24 = vector.broadcast %23 : vector<16x1xf32> to vector<16x128xf32>
    %25 = arith.mulf %14, %24 : vector<16x128xf32>
    %26 = vector.broadcast %6 : vector<1x128xf32> to vector<16x128xf32>
    %27 = arith.mulf %25, %26 : vector<16x128xf32>
    %28 = vector.broadcast %8 : vector<1x128xf32> to vector<16x128xf32>
    %29 = arith.addf %27, %28 : vector<16x128xf32>
    %30 = vector.shape_cast %29 : vector<16x128xf32> to vector<2x8x128xf32>
    %cst_13 = arith.constant dense<0.000000e+00> : vector<2x128xf32>
    %31 = vector.multi_reduction <add>, %30, %cst_13 [1] : vector<2x8x128xf32> to vector<2x128xf32>
    %32 = vector.shape_cast %31 : vector<2x128xf32> to vector<2x1x128xf32>
    %cst_14 = arith.constant 8.000000e+00 : f32
    %33 = vector.broadcast %cst_14 : f32 to vector<2x1x128xf32>
    %34 = arith.divf %32, %33 : vector<2x1x128xf32>
    %35 = vector.shape_cast %4 : vector<16x128xf32> to vector<2x8x128xf32>
    %36 = vector.broadcast %34 : vector<2x1x128xf32> to vector<2x8x128xf32>
    %37 = arith.addf %35, %36 : vector<2x8x128xf32>
    %38 = vector.shape_cast %37 : vector<2x8x128xf32> to vector<16x128xf32>
    %c0_15 = arith.constant 0 : index
    %c0_16 = arith.constant 0 : index
    %c0_17 = arith.constant 0 : index
    %39 = vector.load %arg11[%c0_15, %c0_16, %c0_17] : memref<1x1x128xf32, #tpu.memory_space<vmem>>, vector<1x1x128xf32>
    %40 = vector.shape_cast %39 : vector<1x1x128xf32> to vector<1x128xf32>
    %c0_18 = arith.constant 0 : index
    %c0_19 = arith.constant 0 : index
    %c0_20 = arith.constant 0 : index
    %41 = vector.load %arg12[%c0_18, %c0_19, %c0_20] : memref<1x1x128xf32, #tpu.memory_space<vmem>>, vector<1x1x128xf32>
    %42 = vector.shape_cast %41 : vector<1x1x128xf32> to vector<1x128xf32>
    %cst_21 = arith.constant dense<0.000000e+00> : vector<16xf32>
    %43 = vector.multi_reduction <add>, %38, %cst_21 [1] : vector<16x128xf32> to vector<16xf32>
    %44 = vector.shape_cast %43 : vector<16xf32> to vector<16x1xf32>
    %cst_22 = arith.constant 1.280000e+02 : f32
    %45 = vector.broadcast %cst_22 : f32 to vector<16x1xf32>
    %46 = arith.divf %44, %45 : vector<16x1xf32>
    %47 = vector.broadcast %46 : vector<16x1xf32> to vector<16x128xf32>
    %48 = arith.subf %38, %47 : vector<16x128xf32>
    %49 = arith.mulf %48, %48 : vector<16x128xf32>
    %cst_23 = arith.constant dense<0.000000e+00> : vector<16xf32>
    %50 = vector.multi_reduction <add>, %49, %cst_23 [1] : vector<16x128xf32> to vector<16xf32>
    %51 = vector.shape_cast %50 : vector<16xf32> to vector<16x1xf32>
    %cst_24 = arith.constant 0.00787401571 : f32
    %52 = vector.broadcast %cst_24 : f32 to vector<16x1xf32>
    %53 = arith.mulf %51, %52 : vector<16x1xf32>
    %54 = math.sqrt %53 : vector<16x1xf32>
    %cst_25 = arith.constant 9.99999997E-7 : f32
    %55 = vector.broadcast %cst_25 : f32 to vector<16x1xf32>
    %56 = arith.addf %54, %55 : vector<16x1xf32>
    %57 = tpu.reciprocal %56 {approx = true} : vector<16x1xf32> -> vector<16x1xf32>
    %58 = vector.broadcast %57 : vector<16x1xf32> to vector<16x128xf32>
    %59 = arith.mulf %48, %58 : vector<16x128xf32>
    %60 = vector.broadcast %40 : vector<1x128xf32> to vector<16x128xf32>
    %61 = arith.mulf %59, %60 : vector<16x128xf32>
    %62 = vector.broadcast %42 : vector<1x128xf32> to vector<16x128xf32>
    %63 = arith.addf %61, %62 : vector<16x128xf32>
    %c0_26 = arith.constant 0 : index
    %c0_27 = arith.constant 0 : index
    %c0_28 = arith.constant 0 : index
    %64 = vector.load %arg13[%c0_26, %c0_27, %c0_28] : memref<1x128x512xf32, #tpu.memory_space<vmem>>, vector<1x128x512xf32>
    %65 = vector.shape_cast %64 : vector<1x128x512xf32> to vector<128x512xf32>
    %cst_29 = arith.constant dense<0.000000e+00> : vector<16x512xf32>
    %66 = tpu.matmul %63, %65, %cst_29 {dimension_numbers = #tpu.dot_dimension_numbers<[1], [0], [0], [1], [0, 0, 1, 1], [], []>} : vector<16x128xf32>, vector<128x512xf32>, vector<16x512xf32> -> vector<16x512xf32>
    %c0_30 = arith.constant 0 : index
    %c0_31 = arith.constant 0 : index
    %c0_32 = arith.constant 0 : index
    %67 = vector.load %arg14[%c0_30, %c0_31, %c0_32] : memref<1x1x512xf32, #tpu.memory_space<vmem>>, vector<1x1x512xf32>
    %68 = vector.shape_cast %67 : vector<1x1x512xf32> to vector<1x512xf32>
    %69 = vector.broadcast %68 : vector<1x512xf32> to vector<16x512xf32>
    %70 = arith.addf %66, %69 : vector<16x512xf32>
    %cst_33 = arith.constant 5.000000e-01 : f32
    %71 = vector.broadcast %cst_33 : f32 to vector<16x512xf32>
    %72 = arith.mulf %71, %70 : vector<16x512xf32>
    %cst_34 = arith.constant 0.707106769 : f32
    %73 = vector.broadcast %cst_34 : f32 to vector<16x512xf32>
    %74 = arith.mulf %70, %73 : vector<16x512xf32>
    %75 = math.erf %74 : vector<16x512xf32>
    %cst_35 = arith.constant 1.000000e+00 : f32
    %76 = vector.broadcast %cst_35 : f32 to vector<16x512xf32>
    %77 = arith.addf %76, %75 : vector<16x512xf32>
    %78 = arith.mulf %72, %77 : vector<16x512xf32>
    %c0_36 = arith.constant 0 : index
    %c0_37 = arith.constant 0 : index
    %c0_38 = arith.constant 0 : index
    %79 = vector.load %arg15[%c0_36, %c0_37, %c0_38] : memref<1x512x128xf32, #tpu.memory_space<vmem>>, vector<1x512x128xf32>
    %80 = vector.shape_cast %79 : vector<1x512x128xf32> to vector<512x128xf32>
    %cst_39 = arith.constant dense<0.000000e+00> : vector<16x128xf32>
    %81 = tpu.matmul %78, %80, %cst_39 {dimension_numbers = #tpu.dot_dimension_numbers<[1], [0], [0], [1], [0, 0, 1, 1], [], []>} : vector<16x512xf32>, vector<512x128xf32>, vector<16x128xf32> -> vector<16x128xf32>
    %c0_40 = arith.constant 0 : index
    %c0_41 = arith.constant 0 : index
    %c0_42 = arith.constant 0 : index
    %82 = vector.load %arg16[%c0_40, %c0_41, %c0_42] : memref<1x1x128xf32, #tpu.memory_space<vmem>>, vector<1x1x128xf32>
    %83 = vector.shape_cast %82 : vector<1x1x128xf32> to vector<1x128xf32>
    %84 = vector.broadcast %83 : vector<1x128xf32> to vector<16x128xf32>
    %85 = arith.addf %81, %84 : vector<16x128xf32>
    %86 = arith.addf %38, %85 : vector<16x128xf32>
    %c1_i32 = arith.constant 1 : i32
    %87 = arith.cmpi slt, %arg1, %c1_i32 : i32
    %88 = arith.extui %87 : i1 to i32
    %c0_i32_43 = arith.constant 0 : i32
    %89 = arith.cmpi ne, %88, %c0_i32_43 : i32
    scf.if %89 {
      %93 = vector.shape_cast %86 : vector<16x128xf32> to vector<2x8x128xf32>
      %c0_46 = arith.constant 0 : index
      %c0_47 = arith.constant 0 : index
      %c0_48 = arith.constant 0 : index
      %94 = vector.load %arg19[%c0_46, %c0_47, %c0_48] : memref<2x8x128xf32, #tpu.memory_space<vmem>>, vector<2x8x128xf32>
      tpu.vector_store %arg19[%c0_46, %c0_47, %c0_48], %93 {strides = array<i32>} : memref<2x8x128xf32, #tpu.memory_space<vmem>>, vector<2x8x128xf32>,
    } else {
    }
    %c1_i32_44 = arith.constant 1 : i32
    %90 = arith.cmpi eq, %arg1, %c1_i32_44 : i32
    %91 = arith.extui %90 : i1 to i32
    %c0_i32_45 = arith.constant 0 : i32
    %92 = arith.cmpi ne, %91, %c0_i32_45 : i32
    scf.if %92 {
      %c0_46 = arith.constant 0 : index
      %c0_47 = arith.constant 0 : index
      %93 = vector.load %arg17[%c0_46, %c0_47] : memref<1x128xf32, #tpu.memory_space<vmem>>, vector<1x128xf32>
      %c0_48 = arith.constant 0 : index
      %c0_49 = arith.constant 0 : index
      %94 = vector.load %arg18[%c0_48, %c0_49] : memref<1x128xf32, #tpu.memory_space<vmem>>, vector<1x128xf32>
      %cst_50 = arith.constant dense<0.000000e+00> : vector<16xf32>
      %95 = vector.multi_reduction <add>, %86, %cst_50 [1] : vector<16x128xf32> to vector<16xf32>
      %96 = vector.shape_cast %95 : vector<16xf32> to vector<16x1xf32>
      %cst_51 = arith.constant 1.280000e+02 : f32
      %97 = vector.broadcast %cst_51 : f32 to vector<16x1xf32>
      %98 = arith.divf %96, %97 : vector<16x1xf32>
      %99 = vector.broadcast %98 : vector<16x1xf32> to vector<16x128xf32>
      %100 = arith.subf %86, %99 : vector<16x128xf32>
      %101 = arith.mulf %100, %100 : vector<16x128xf32>
      %cst_52 = arith.constant dense<0.000000e+00> : vector<16xf32>
      %102 = vector.multi_reduction <add>, %101, %cst_52 [1] : vector<16x128xf32> to vector<16xf32>
      %103 = vector.shape_cast %102 : vector<16xf32> to vector<16x1xf32>
      %cst_53 = arith.constant 0.00787401571 : f32
      %104 = vector.broadcast %cst_53 : f32 to vector<16x1xf32>
      %105 = arith.mulf %103, %104 : vector<16x1xf32>
      %106 = math.sqrt %105 : vector<16x1xf32>
      %cst_54 = arith.constant 9.99999997E-7 : f32
      %107 = vector.broadcast %cst_54 : f32 to vector<16x1xf32>
      %108 = arith.addf %106, %107 : vector<16x1xf32>
      %109 = tpu.reciprocal %108 {approx = true} : vector<16x1xf32> -> vector<16x1xf32>
      %110 = vector.broadcast %109 : vector<16x1xf32> to vector<16x128xf32>
      %111 = arith.mulf %100, %110 : vector<16x128xf32>
      %112 = vector.broadcast %93 : vector<1x128xf32> to vector<16x128xf32>
      %113 = arith.mulf %111, %112 : vector<16x128xf32>
      %114 = vector.broadcast %94 : vector<1x128xf32> to vector<16x128xf32>
      %115 = arith.addf %113, %114 : vector<16x128xf32>
      %116 = vector.shape_cast %115 : vector<16x128xf32> to vector<2x8x128xf32>
      %c0_55 = arith.constant 0 : index
      %c0_56 = arith.constant 0 : index
      %c0_57 = arith.constant 0 : index
      %117 = vector.load %arg19[%c0_55, %c0_56, %c0_57] : memref<2x8x128xf32, #tpu.memory_space<vmem>>, vector<2x8x128xf32>
      tpu.vector_store %arg19[%c0_55, %c0_56, %c0_57], %116 {strides = array<i32>} : memref<2x8x128xf32, #tpu.memory_space<vmem>>, vector<2x8x128xf32>,
    } else {
    }
    return
  }
  func.func @transform_0(%arg0: i32, %arg1: i32) -> (i32, i32, i32) {
    %c0_i32 = arith.constant 0 : i32
    %c0_i32_0 = arith.constant 0 : i32
    %c0_i32_1 = arith.constant 0 : i32
    return %arg0, %c0_i32, %c0_i32_0 : i32, i32, i32
  }
  func.func @transform_1(%arg0: i32, %arg1: i32) -> (i32, i32) {
    %c0_i32 = arith.constant 0 : i32
    %c0_i32_0 = arith.constant 0 : i32
    %c0_i32_1 = arith.constant 0 : i32
    return %c0_i32, %c0_i32_0 : i32, i32
  }
  func.func @transform_2(%arg0: i32, %arg1: i32) -> (i32, i32) {
    %c0_i32 = arith.constant 0 : i32
    %c0_i32_0 = arith.constant 0 : i32
    %c0_i32_1 = arith.constant 0 : i32
    return %c0_i32, %c0_i32_0 : i32, i32
  }
  func.func @transform_3(%arg0: i32, %arg1: i32) -> (i32, i32) {
    %c0_i32 = arith.constant 0 : i32
    %c0_i32_0 = arith.constant 0 : i32
    %c0_i32_1 = arith.constant 0 : i32
    return %c0_i32, %c0_i32_0 : i32, i32
  }
  func.func @transform_4(%arg0: i32, %arg1: i32) -> (i32, i32) {
    %c0_i32 = arith.constant 0 : i32
    %c0_i32_0 = arith.constant 0 : i32
    %c0_i32_1 = arith.constant 0 : i32
    return %c0_i32, %c0_i32_0 : i32, i32
  }
  func.func @transform_5(%arg0: i32, %arg1: i32) -> (i32, i32) {
    %c0_i32 = arith.constant 0 : i32
    %c0_i32_0 = arith.constant 0 : i32
    %c0_i32_1 = arith.constant 0 : i32
    return %c0_i32, %c0_i32_0 : i32, i32
  }
  func.func @transform_6(%arg0: i32, %arg1: i32) -> (i32, i32) {
    %c0_i32 = arith.constant 0 : i32
    %c0_i32_0 = arith.constant 0 : i32
    %c0_i32_1 = arith.constant 0 : i32
    return %c0_i32, %c0_i32_0 : i32, i32
  }
  func.func @transform_7(%arg0: i32, %arg1: i32) -> (i32, i32, i32) {
    %c0_i32 = arith.constant 0 : i32
    %c0_i32_0 = arith.constant 0 : i32
    %c0_i32_1 = arith.constant 0 : i32
    return %arg1, %c0_i32, %c0_i32_0 : i32, i32, i32
  }
  func.func @transform_8(%arg0: i32, %arg1: i32) -> (i32, i32, i32) {
    %c0_i32 = arith.constant 0 : i32
    %c0_i32_0 = arith.constant 0 : i32
    %c0_i32_1 = arith.constant 0 : i32
    return %arg1, %c0_i32, %c0_i32_0 : i32, i32, i32
  }
  func.func @transform_9(%arg0: i32, %arg1: i32) -> (i32, i32, i32) {
    %c0_i32 = arith.constant 0 : i32
    %c0_i32_0 = arith.constant 0 : i32
    %c0_i32_1 = arith.constant 0 : i32
    return %arg1, %c0_i32, %c0_i32_0 : i32, i32, i32
  }
  func.func @transform_10(%arg0: i32, %arg1: i32) -> (i32, i32, i32) {
    %c0_i32 = arith.constant 0 : i32
    %c0_i32_0 = arith.constant 0 : i32
    %c0_i32_1 = arith.constant 0 : i32
    return %arg1, %c0_i32, %c0_i32_0 : i32, i32, i32
  }
  func.func @transform_11(%arg0: i32, %arg1: i32) -> (i32, i32, i32) {
    %c0_i32 = arith.constant 0 : i32
    %c0_i32_0 = arith.constant 0 : i32
    %c0_i32_1 = arith.constant 0 : i32
    return %arg1, %c0_i32, %c0_i32_0 : i32, i32, i32
  }
  func.func @transform_12(%arg0: i32, %arg1: i32) -> (i32, i32, i32) {
    %c0_i32 = arith.constant 0 : i32
    %c0_i32_0 = arith.constant 0 : i32
    %c0_i32_1 = arith.constant 0 : i32
    return %arg1, %c0_i32, %c0_i32_0 : i32, i32, i32
  }
  func.func @transform_13(%arg0: i32, %arg1: i32) -> (i32, i32, i32) {
    %c0_i32 = arith.constant 0 : i32
    %c0_i32_0 = arith.constant 0 : i32
    %c0_i32_1 = arith.constant 0 : i32
    return %arg1, %c0_i32, %c0_i32_0 : i32, i32, i32
  }
  func.func @transform_14(%arg0: i32, %arg1: i32) -> (i32, i32, i32) {
    %c0_i32 = arith.constant 0 : i32
    %c0_i32_0 = arith.constant 0 : i32
    %c0_i32_1 = arith.constant 0 : i32
    return %arg1, %c0_i32, %c0_i32_0 : i32, i32, i32
  }
  func.func @transform_15(%arg0: i32, %arg1: i32) -> (i32, i32) {
    %c0_i32 = arith.constant 0 : i32
    %c0_i32_0 = arith.constant 0 : i32
    %c0_i32_1 = arith.constant 0 : i32
    return %c0_i32, %c0_i32_0 : i32, i32
  }
  func.func @transform_16(%arg0: i32, %arg1: i32) -> (i32, i32) {
    %c0_i32 = arith.constant 0 : i32
    %c0_i32_0 = arith.constant 0 : i32
    %c0_i32_1 = arith.constant 0 : i32
    return %c0_i32, %c0_i32_0 : i32, i32
  }
  func.func @transform_17(%arg0: i32, %arg1: i32) -> (i32, i32, i32) {
    %c0_i32 = arith.constant 0 : i32
    %c0_i32_0 = arith.constant 0 : i32
    %c0_i32_1 = arith.constant 0 : i32
    return %arg0, %c0_i32, %c0_i32_0 : i32, i32, i32
  }
}

</mosaic_0001>

<bundles_post_ra>
// kernel: poolformer_forward.1
= control target key start
LH: loop header
LB: loop body
LE: loop exit
PB: predicated region body
PF: predicated region fallthrough
CT: control target
= control target key end

     0   :  { %s3644_s0 = inlined_call_operand.vmem [shape: f32[4,8,4], index: 0, kind: input, shape index: {}]   ;;  %s3645_s1 = inlined_call_operand.vmem [shape: f32[4,128], index: 1, kind: input, shape index: {}]   ;;  %s3646_s2 = inlined_call_operand.vmem [shape: f32[1,128], index: 2, kind: input, shape index: {}]   ;;  %s3647_s3 = inlined_call_operand.hbm [shape: f32[128,512], index: 3, kind: input, shape index: {}]   ;;  %s3648_s4 = inlined_call_operand.vmem [shape: f32[1,512], index: 4, kind: input, shape index: {}]   ;;  %s3649_s5 = inlined_call_operand.hbm [shape: f32[512,128], index: 5, kind: input, shape index: {}]   ;;  %s3650_s6 = inlined_call_operand.vmem [shape: f32[1,128], index: 6, kind: input, shape index: {}]   ;;  %s3651_s7 = inlined_call_operand.vmem [shape: f32[2,1,128], index: 7, kind: input, shape index: {}]   ;;  %s3652_s8 = inlined_call_operand.vmem [shape: f32[2,1,128], index: 8, kind: input, shape index: {}]   ;;  %s3653_s9 = inlined_call_operand.vmem [shape: f32[2,1,128], index: 9, kind: input, shape index: {}]   ;;  %s3654_s10 = inlined_call_operand.vmem [shape: f32[2,1,128], index: 10, kind: input, shape index: {}]   ;;  %s3655_s11 = inlined_call_operand.hbm [shape: f32[2,128,512], index: 11, kind: input, shape index: {}]   ;;  %s3656_s12 = inlined_call_operand.vmem [shape: f32[2,1,512], index: 12, kind: input, shape index: {}]   ;;  %s3657_s13 = inlined_call_operand.hbm [shape: f32[2,512,128], index: 13, kind: input, shape index: {}]   ;;  %s3658_s14 = inlined_call_operand.vmem [shape: f32[2,1,128], index: 14, kind: input, shape index: {}]   ;;  %s3659_s15 = inlined_call_operand.vmem [shape: f32[1,128], index: 15, kind: input, shape index: {}]   ;;  %s3660_s16 = inlined_call_operand.vmem [shape: f32[1,128], index: 16, kind: input, shape index: {}]   ;;  %s3661_s17 = inlined_call_operand.hbm [shape: f32[4,8,128], index: 17, kind: output, shape index: {}]  }
   0x1   :  { %3677 = sst [smem:[#allocation26_spill]] %s3644_s0 }
   0x2   :  { %3678 = sst [smem:[#allocation27_spill]] %s3645_s1 }
   0x3   :  { %3679 = sst [smem:[#allocation28_spill]] %s3646_s2 }
   0x4   :  { %3680 = sst [smem:[#allocation29_spill]] %s3647_s3 }
   0x5   :  { %3681 = sst [smem:[#allocation30_spill]] %s3648_s4 }
   0x6   :  { %3682 = sst [smem:[#allocation31_spill]] %s3649_s5 }
   0x7   :  { %3683 = sst [smem:[#allocation32_spill]] %s3650_s6 }
   0x8   :  { %3684 = sst [smem:[#allocation33_spill]] %s3651_s7 }
   0x9   :  { %3685 = sst [smem:[#allocation34_spill]] %s3652_s8 }
   0xa   :  { %3686 = sst [smem:[#allocation35_spill]] %s3653_s9 }
   0xb   :  { %3687 = sst [smem:[#allocation36_spill]] %s3654_s10 }
   0xc   :  { %3688 = sst [smem:[#allocation37_spill]] %s3655_s11 }
   0xd   :  { %3689 = sst [smem:[#allocation38_spill]] %s3656_s12 }
   0xe   :  { %3690 = sst [smem:[#allocation39_spill]] %s3657_s13 }
   0xf   :  { %3691 = sst [smem:[#allocation40_spill]] %s3658_s14 }
  0x10   :  { %3692 = sst [smem:[#allocation41_spill]] %s3659_s15 }
  0x11   :  { %3693 = sst [smem:[#allocation42_spill]] %s3660_s16 }
  0x12   :  { %3694 = sst [smem:[#allocation43_spill]] %s3661_s17 }
  0x13   :  { %22 = vsyncpa [#allocation3], 0 }
  0x14   :  { %23 = vsyncpa [#allocation6], 0 }
  0x15   :  { %24 = vsyncpa [#allocation4], 0 }
  0x16   :  { %26 = vsyncpa [#allocation4 + $0x1], 0  ;;  %s2832_s24 = smov 0   ;;  %s2834_s25 = smov 0  }
  0x17   :  { %s2836_s26 = smov 0   ;;  %s2838_s27 = smov 0  }
  0x18   :  { %s2840_s28 = smov 0   ;;  %s2842_s29 = smov 0  }
  0x19   :  { %s2844_s0 = smov 0   ;;  %s2846_s30 = smov 0  }
  0x1a   :  { %s2848_s18 = smov 0   ;;  %s2850_s19 = smov 0  }
  0x1b   :  { %s2852_s1 = smov 0  }
  0x1c LB: > { %3695 = sst [smem:[#allocation14_spill]] %s2690_s24  ;;  %s2886_s20 = sadd.s32 4294967295, %s2730_s1   ;;  %s2730_s1 = sphi %s2852_s1, %s32_s1   ;;  %s2726_s19 = sphi %s2850_s19, %s3768_s19   ;;  %s2722_s18 = sphi %s2848_s18, %s3767_s18   ;;  %s2718_s30 = sphi %s2846_s30, %s3766_s30   ;;  %s2714_s0 = sphi %s2844_s0, %s3765_s0   ;;  %s2710_s29 = sphi %s2842_s29, %s3764_s29   ;;  %s2706_s28 = sphi %s2840_s28, %s3763_s28   ;;  %s2702_s27 = sphi %s2838_s27, %s3762_s27   ;;  %s2698_s26 = sphi %s2836_s26, %s3771_s26   ;;  %s2694_s25 = sphi %s2834_s25, %s3770_s25   ;;  %s2690_s24 = sphi %s2832_s24, %s3769_s24  }
  0x1d   : > { %3696 = sst [smem:[#allocation15_spill]] %s2706_s28  ;;  %s2249_s21 = sadd.s32 4294967294, %s2730_s1  }
  0x1e   : > { %3697 = sst [smem:[#allocation16_spill]] %s2710_s29  ;;  %p320_p0 = scmp.ne.s32.totalorder %s2706_s28, %s2702_s27 }
  0x1f   : > { %3698 = sst [smem:[#allocation17_spill]] %s2714_s0  ;;  %p321_p1 = scmp.eq.s32.totalorder %s2886_s20, 0 }
  0x20   : > { %3699 = sst [smem:[#allocation18_spill]] %s2718_s30  ;;  %p463_p2 = scmp.ne.s32.totalorder %s2698_s26, %s2694_s25 }
  0x21   : > { %3700 = sst [smem:[#allocation19_spill]] %s2722_s18  ;;  %p2896_p3 = por %p321_p1, %p320_p0 }
  0x22   : > { %3701 = sst [smem:[#allocation20_spill]] %s2726_s19  ;;  %p464_p4 = scmp.eq.s32.totalorder %s2886_s20, 3 }
  0x23   : > { %p469_p5 = scmp.ne.s32.totalorder %s2694_s25, %s2690_s24  ;;  %p470_p6 = scmp.eq.s32.totalorder %s2249_s21, 3 }
  0x24   : > { %p2903_p7 = por %p464_p4, %p463_p2  ;;  %p2250_p8 = scmp.ge.s32.totalorder %s2730_s1, 1 }
  0x25   : > { %p2908_p9 = por %p470_p6, %p469_p5  ;;  %p477_p10 = scmp.lt.s32.totalorder %s2730_s1, 5 }
  0x26   : > { %s3703_s17 = scalar_select %p2903_p7, 1, 0 }
  0x27   : > { %s3705_s27 = scalar_select %p2908_p9, 1, 0 }
  0x28   : > { %3704 = sst [smem:[#allocation21_spill]] %s3703_s17  ;;  %p2916_p11 = pnand %p2250_p8, %p477_p10 }
  0x29   : > { %3706 = sst [smem:[#allocation22_spill]] %s3705_s27  ;;  %s2732_s27 = smov [#allocation2]  }
  0x2a   : > { %s3707_s3 = sld [smem:[#allocation29_spill]]  ;;  %p2305_p12 = pneg %p2916_p11 }
  0x2b   : > { %s496_s17 = sshll.u32 %s2732_s27, 4  ;;  %s3667_s22 = smov 512   ;;  %s497_s17 = int_to_ptr.vmem [resolvable:$true] %s496_s17 }
  0x2c   : > { %p2924_p13 = pnand %p2305_p12, %p321_p1  ;;  %s41_s15 = sadd.s32 1, %s2722_s18 }
  0x2d   : > { %p42_p0 = scmp.ge.s32.totalorder %s41_s15, 2  ;;  %s44_s27 = sadd.s32 1, %s2726_s19 }
  0x2e   : > { %s307_s6 = sadd.s32 1, %s2710_s29  ;;  %p314_p2 = scmp.ne.s32.totalorder %s2710_s29, %s2706_s28 }
  0x2f   : > { %s3773_s15 = smov (%p42_p0, %s41_s15), 0  ;;  %s3775_s27 = smov (!%p42_p0, %s44_s27), %s2726_s19 }
  0x30   : > { %s494_s24 = sshll.u32 %s3707_s3, 4  ;;  %s3668_s3 = smov 32   ;;  %s495_s24 = int_to_ptr.hbm [resolvable:$true] %s494_s24 }
  0x31   : > { %2308 = dma.hbm_to_vmem [thread:$0]  (!%p2924_p13), %s495_s24, 8192, %s497_s17, [#allocation3], %s3667_s22, %s3667_s22, %s3668_s3  }
  0x32   : > { %3710 = sst [smem:[#allocation23_spill]] %s3773_s15  ;;  %s304_s4 = ssub.s32 %s2722_s18, %s3773_s15 }
  0x33   : > { %p315_p4 = scmp.eq.s32.totalorder %s2730_s1, 0  ;;  %p46_p5 = scmp.ge.s32.totalorder %s3775_s27, 2 }
  0x34   : > { %p305_p6 = scmp.eq.s32.totalorder %s304_s4, 0  ;;  %p2325_p10 = scmp.lt.s32.totalorder %s2730_s1, 4 }
  0x35   : > { %p2944_p8 = por %p315_p4, %p314_p2  ;;  %s3777_s27 = smov (%p46_p5, %s3775_s27), 0 }
  0x36   : > { %3712 = sst [smem:[#allocation24_spill]] %s3777_s27  ;;  %s450_s22 = ssub.s32 %s2726_s19, %s3777_s27 }
  0x37   : > { %s2952_s24 = scalar_select %p305_p6, %s2710_s29, %s307_s6  }
  0x38   : > { %s569_s3 = sand.u32 1, %s2730_s1   ;;  %p451_p12 = scmp.eq.s32.totalorder %s450_s22, 0 }
  0x39   : > { %3713 = sst [smem:[#allocation25_spill]] %s2952_s24  ;;  %s571_s2 = sand.u32 1, %s2710_s29  }
  0x3a   : > { %s2288_s15 = sshll.u32 %s2722_s18, 9  ;;  %s3714_s14 = sadd.s32 1, %s2698_s26 }
  0x3b   : > { %s2962_s12 = scalar_select %p451_p12, %s2698_s26, %s3714_s14  }
  0x3c   : > { %s2254_s4 = sshll.u32 %s571_s2, 9  ;;  %s3715_s11 = sld [smem:[#allocation37_spill]] }
  0x3d   : > { %s573_s0 = scalar_lea.vmem [#allocation7], %s2254_s4  ;;  %p2971_p0 = pnand %p2325_p10, %p2944_p8 }
  0x3e   : > { %s581_s30 = sshll.u32 %s573_s0, 4  ;;  %s3717_s5 = sld [smem:[#allocation31_spill]]  ;;  %s582_s30 = int_to_ptr.vmem [resolvable:$true] %s581_s30 }
  0x3f   : > { %s570_s9 = scalar_lea.sflag [#allocation3], %s569_s3  ;;  %s3719_s10 = smov 512  }
  0x40   : > { %s2735_s0 = smov [#allocation5]   ;;  %s2737_s27 = smov 8  }
  0x41   : > { %s513_s17 = sshll.u32 %s2735_s0, 4  ;;  %s3720_s13 = sld [smem:[#allocation39_spill]]  ;;  %s514_s17 = int_to_ptr.vmem [resolvable:$true] %s513_s17 }
  0x42   : > { %s578_s8 = scalar_lea.hbm %s3715_s11, %s2288_s15  ;;  %s2736_s11 = smov 128  }
  0x43   : > { %s579_s7 = sshll.u32 %s578_s8, 4  ;;  %s3718_s8 = smov 32   ;;  %s580_s7 = int_to_ptr.hbm [resolvable:$true] %s579_s7 }
  0x44   : > { %s511_s2 = sshll.u32 %s3717_s5, 4  ;;  %s602_s5 = scalar_lea.vmem [#allocation8], %s2254_s4  ;;  %s512_s2 = int_to_ptr.hbm [resolvable:$true] %s511_s2 }
  0x45   : > { %2315 = dma.hbm_to_vmem [thread:$0]  (!%p2971_p0), %s580_s7, 8192, %s582_s30, %s570_s9, %s3719_s10, %s3719_s10, %s3718_s8  }
  0x46   : > { %2311 = dma.hbm_to_vmem [thread:$0]  (!%p2924_p13), %s512_s2, 8192, %s514_s17, [#allocation6], %s2736_s11, %s2736_s11, %s2737_s27  }
  0x47   : > { %s607_s22 = scalar_lea.hbm %s3720_s13, %s2288_s15  ;;  %s610_s24 = sshll.u32 %s602_s5, 4  ;;  %s611_s24 = int_to_ptr.vmem [resolvable:$true] %s610_s24 }
  0x48   : > { %s608_s14 = sshll.u32 %s607_s22, 4  ;;  %628 = sbr.rel (%p2916_p11) target bundleno = 1773 (0x6ed), region = 88  ;;  %s609_s14 = int_to_ptr.hbm [resolvable:$true] %s608_s14 }
  0x49   : > { %2318 = dma.hbm_to_vmem [thread:$0]  (!%p2971_p0), %s609_s14, 8192, %s611_s24, %s570_s9, %s2736_s11, %s2736_s11, %s2737_s27  }
  0x4d   : > { %2673 = dma.done.wait (%p321_p1), [#allocation3], 8192  }
  0x4e   : > { %2675 = vsyncadd (%p321_p1), [#allocation3], 4294959104 }
  0x4f   : > { %2677 = dma.done.wait (%p321_p1), [#allocation6], 8192  }
  0x50   : > { %2679 = vsyncadd (%p321_p1), [#allocation6], 4294959104  ;;  %s640_s3 = sand.u32 1, %s2886_s20   ;;  %s642_s5 = sand.u32 1, %s2706_s28  }
  0x51   : > { %s2263_s7 = sshll.u32 %s642_s5, 9  ;;  %s641_s11 = scalar_lea.sflag [#allocation3], %s640_s3 }
  0x52   : > { %s3002_s15 = scalar_lea.vmem [#allocation7], %s2263_s7 }
  0x53   : > { %2681 = dma.done.wait (%p2896_p3), %s641_s11, 16384  }
  0x54   : > { %2683 = vsyncadd (%p2896_p3), %s641_s11, 4294950912  ;;  %s3721_s30 = sld [smem:[#allocation18_spill]]  ;;  %s3674_s19 = sand.u32 1, %s2694_s25  }
  0x55   : > { %s3722_s18 = sld [smem:[#allocation17_spill]]  ;;  %s2265_s21 = sshll.u32 %s3674_s19, 4 }
  0x56   : > { %s3723_s4 = sld [smem:[#allocation26_spill]]  ;;  %s3047_s0 = scalar_lea.vmem [#allocation8], %s2263_s7 }
  0x57   : > { %s3725_s22 = sld [smem:[#allocation34_spill]]  ;;  %s3049_s17 = scalar_lea.vmem [#allocation9], %s2265_s21 }
  0x58   : > { %s3726_s11 = sld [smem:[#allocation35_spill]] }
  0x59   : > { %s3728_s24 = sld [smem:[#allocation38_spill]] }
  0x5a   : > { %s2266_s16 = sshll.u32 %s3721_s30, 1  ;;  %s3729_s8 = sld [smem:[#allocation40_spill]] }
  0x5b   : > { %p736_p1 = scmp.lt.s32.totalorder %s2266_s16, 3  ;;  %p741_p11 = scmp.lt.s32.totalorder %s3722_s18, 1 }
  0x5c   : > { %p2269_p3 = scmp.ne.s32.totalorder %s3722_s18, 0 }
  0x5d   : > { %s3779_s16 = smov (!%p736_p1, %s2266_s16), 3  ;;  %s3730_s19 = sld [smem:[#allocation27_spill]] (!%p2269_p3) }
  0x5e   : > { %s3014_s20 = scalar_select %p741_p11, %s3722_s18, 1 }
  0x5f   : > { %s2267_s23 = sshll.u32 %s3779_s16, 3  ;;  %s3727_s16 = sld [smem:[#allocation36_spill]] }
  0x60   : > { %s3019_s6 = scalar_lea.vmem %s3723_s4, %s2267_s23  ;;  %s746_s14 = scalar_lea.vmem %s3725_s22, %s3014_s20 }
  0x61   : > { %s749_s30 = scalar_lea.vmem %s3726_s11, %s3014_s20  ;;  %s2268_s28 = sshll.u32 %s3014_s20, 2 }
  0x62   : > { %s3041_s4 = scalar_lea.vmem %s3728_s24, %s2268_s28  ;;  %s759_s10 = scalar_lea.vmem %s3729_s8, %s3014_s20 }
  0x63   : > { %764 = sbr.rel (%p2269_p3) target bundleno = 517 (0x205), region = 108  ;;  %s3731_s18 = sld [smem:[#allocation28_spill]] (!%p2269_p3) }
  0x64   : > { %s3732_s3 = sld [smem:[#allocation30_spill]] (!%p2269_p3) }
  0x65   : > { %s752_s29 = scalar_lea.vmem %s3727_s16, %s3014_s20  ;;  %s3733_s16 = sld [smem:[#allocation32_spill]] (!%p2269_p3) }
  0x68   : > { %v767_v0 = vld [vmem:[%s3730_s19] sm:$0xf]  ;;  %vm779_vm0 = vcmask 1043456   ;;  %vm772_vm1 = vcmask 31744   ;;  %v867_v3 = vld [vmem:[#allocation2 + $0x1e8] sm:$0xff]  ;;  %v868_v4 = vld [vmem:[#allocation2 + $0x1f0] sm:$0xff] }
  0x69   : > { %v765_v1 = vld [vmem:[%s3019_s6] sm:$0xff]  ;;  %2270 = vmatpush.msk.msra.mxu0 %vm779_vm0, %v767_v0  ;;  %v869_v5 = vld [vmem:[#allocation2 + $0x1f8] sm:$0xff]  ;;  %v863_v7 = vld [vmem:[#allocation2 + $0x1c8] sm:$0xff]  ;;  %903 = vmatpush.msra.mxu2 %v867_v3 }
  0x6a   : > { %v866_v2 = vld [vmem:[#allocation2 + $0x1e0] sm:$0xff]  ;;  %2271 = vmatmul.msk.f32.vlgmr.msra.gmra.mxu0 %vm772_vm1, %v765_v1  ;;  %926 = vmatpush.msra.mxu3 %v868_v4  ;;  %v864_v8 = vld [vmem:[#allocation2 + $0x1d0] sm:$0xff]  ;;  %v865_v9 = vld [vmem:[#allocation2 + $0x1d8] sm:$0xff] }
  0x6b   : > { %880 = vmatpush.msra.mxu1 %v866_v2  ;;  %v862_v6 = vld [vmem:[#allocation2 + $0x1c0] sm:$0xff]  ;;  %949 = vmatpush.msrb.mxu0 %v869_v5  ;;  %v859_v11 = vld [vmem:[#allocation2 + $0x1a8] sm:$0xff]  ;;  %v860_v12 = vld [vmem:[#allocation2 + $0x1b0] sm:$0xff] }
  0x6c   : > { %v858_v10 = vld [vmem:[#allocation2 + $0x1a0] sm:$0xff]  ;;  %904 = vmatpush.msra.mxu2 %v863_v7  ;;  %927 = vmatpush.msra.mxu3 %v864_v8  ;;  %v861_v13 = vld [vmem:[#allocation2 + $0x1b8] sm:$0xff]  ;;  %v855_v15 = vld [vmem:[#allocation2 + $0x188] sm:$0xff] }
  0x6d   : > { %881 = vmatpush.msra.mxu1 %v862_v6  ;;  %v854_v14 = vld [vmem:[#allocation2 + $0x180] sm:$0xff]  ;;  %950 = vmatpush.msrb.mxu0 %v865_v9  ;;  %v856_v16 = vld [vmem:[#allocation2 + $0x190] sm:$0xff]  ;;  %v766_v17 = vld [vmem:[%s3019_s6 + $0x8] sm:$0xff] }
  0x6e   : > { %905 = vmatpush.msra.mxu2 %v859_v11  ;;  %928 = vmatpush.msra.mxu3 %v860_v12  ;;  %v850_v18 = vld [vmem:[#allocation2 + $0x160] sm:$0xff]  ;;  %v857_v19 = vld [vmem:[#allocation2 + $0x198] sm:$0xff]  ;;  %v851_v20 = vld [vmem:[#allocation2 + $0x168] sm:$0xff] }
  0x6f   : > { %882 = vmatpush.msra.mxu1 %v858_v10  ;;  %951 = vmatpush.msrb.mxu0 %v861_v13  ;;  %v852_v21 = vld [vmem:[#allocation2 + $0x170] sm:$0xff]  ;;  %v846_v22 = vld [vmem:[#allocation2 + $0x140] sm:$0xff]  ;;  %v853_v23 = vld [vmem:[#allocation2 + $0x178] sm:$0xff] }
  0x70   : > { %906 = vmatpush.msra.mxu2 %v855_v15  ;;  %929 = vmatpush.msra.mxu3 %v856_v16  ;;  %v847_v24 = vld [vmem:[#allocation2 + $0x148] sm:$0xff]  ;;  %v848_v25 = vld [vmem:[#allocation2 + $0x150] sm:$0xff]  ;;  %v842_v26 = vld [vmem:[#allocation2 + $0x120] sm:$0xff] }
  0x71   : > { %883 = vmatpush.msra.mxu1 %v854_v14  ;;  %952 = vmatpush.msrb.mxu0 %v857_v19  ;;  %v849_v27 = vld [vmem:[#allocation2 + $0x158] sm:$0xff]  ;;  %v843_v28 = vld [vmem:[#allocation2 + $0x128] sm:$0xff]  ;;  %v844_v29 = vld [vmem:[#allocation2 + $0x130] sm:$0xff] }
  0x72   : > { %2272 = vmatmul.msk.f32.gmra.mxu0 %vm772_vm1, %v766_v17  ;;  %907 = vmatpush.msra.mxu2 %v851_v20  ;;  %v838_v30 = vld [vmem:[#allocation2 + $0x100] sm:$0xff]  ;;  %v845_v31 = vld [vmem:[#allocation2 + $0x138] sm:$0xff]  ;;  %v839_v32 = vld [vmem:[#allocation2 + $0x108] sm:$0xff] }
  0x73   : > { %884 = vmatpush.msra.mxu1 %v850_v18  ;;  %930 = vmatpush.msra.mxu3 %v852_v21  ;;  %v840_v33 = vld [vmem:[#allocation2 + $0x110] sm:$0xff]  ;;  %v834_v34 = vld [vmem:[#allocation2 + $0xe0] sm:$0xff]  ;;  %v841_v35 = vld [vmem:[#allocation2 + $0x118] sm:$0xff] }
  0x74   : > { %953 = vmatpush.msrb.mxu0 %v853_v23  ;;  %908 = vmatpush.msra.mxu2 %v847_v24  ;;  %v835_v36 = vld [vmem:[#allocation2 + $0xe8] sm:$0xff]  ;;  %v836_v37 = vld [vmem:[#allocation2 + $0xf0] sm:$0xff]  ;;  %v830_v38 = vld [vmem:[#allocation2 + $0xc0] sm:$0xff] }
  0x75   : > { %885 = vmatpush.msra.mxu1 %v846_v22  ;;  %931 = vmatpush.msra.mxu3 %v848_v25  ;;  %v837_v39 = vld [vmem:[#allocation2 + $0xf8] sm:$0xff]  ;;  %v831_v40 = vld [vmem:[#allocation2 + $0xc8] sm:$0xff]  ;;  %v832_v41 = vld [vmem:[#allocation2 + $0xd0] sm:$0xff] }
  0x76   : > { %954 = vmatpush.msrb.mxu0 %v849_v27  ;;  %909 = vmatpush.msra.mxu2 %v843_v28  ;;  %v826_v42 = vld [vmem:[#allocation2 + $0xa0] sm:$0xff]  ;;  %v833_v43 = vld [vmem:[#allocation2 + $0xd8] sm:$0xff]  ;;  %v827_v44 = vld [vmem:[#allocation2 + $0xa8] sm:$0xff] }
  0x77   : > { %886 = vmatpush.msra.mxu1 %v842_v26  ;;  %932 = vmatpush.msra.mxu3 %v844_v29  ;;  %v828_v45 = vld [vmem:[#allocation2 + $0xb0] sm:$0xff]  ;;  %v822_v46 = vld [vmem:[#allocation2 + $0x80] sm:$0xff]  ;;  %v829_v47 = vld [vmem:[#allocation2 + $0xb8] sm:$0xff] }
  0x78   : > { %955 = vmatpush.msrb.mxu0 %v845_v31  ;;  %910 = vmatpush.msra.mxu2 %v839_v32  ;;  %v823_v48 = vld [vmem:[#allocation2 + $0x88] sm:$0xff]  ;;  %v824_v49 = vld [vmem:[#allocation2 + $0x90] sm:$0xff]  ;;  %v818_v50 = vld [vmem:[#allocation2 + $0x60] sm:$0xff] }
  0x79   : > { %887 = vmatpush.msra.mxu1 %v838_v30  ;;  %933 = vmatpush.msra.mxu3 %v840_v33  ;;  %v825_v51 = vld [vmem:[#allocation2 + $0x98] sm:$0xff]  ;;  %v819_v52 = vld [vmem:[#allocation2 + $0x68] sm:$0xff]  ;;  %v820_v53 = vld [vmem:[#allocation2 + $0x70] sm:$0xff] }
  0x7a   : > { %956 = vmatpush.msrb.mxu0 %v841_v35  ;;  %911 = vmatpush.msra.mxu2 %v835_v36  ;;  %v814_v54 = vld [vmem:[#allocation2 + $0x40] sm:$0xff]  ;;  %v821_v55 = vld [vmem:[#allocation2 + $0x78] sm:$0xff]  ;;  %v815_v56 = vld [vmem:[#allocation2 + $0x48] sm:$0xff] }
  0x7b   : > { %888 = vmatpush.msra.mxu1 %v834_v34  ;;  %934 = vmatpush.msra.mxu3 %v836_v37  ;;  %v816_v57 = vld [vmem:[#allocation2 + $0x50] sm:$0xff]  ;;  %v817_v58 = vld [vmem:[#allocation2 + $0x58] sm:$0xff]  ;;  %v810_v59 = vld [vmem:[#allocation2 + $0x20] sm:$0xff] }
  0x7c   : > { %957 = vmatpush.msrb.mxu0 %v837_v39  ;;  %912 = vmatpush.msra.mxu2 %v831_v40  ;;  %v811_v60 = vld [vmem:[#allocation2 + $0x28] sm:$0xff]  ;;  %v812_v61 = vld [vmem:[#allocation2 + $0x30] sm:$0xff]  ;;  %v813_v62 = vld [vmem:[#allocation2 + $0x38] sm:$0xff] }
  0x7d   : > { %889 = vmatpush.msra.mxu1 %v830_v38  ;;  %935 = vmatpush.msra.mxu3 %v832_v41  ;;  %v806_v63 = vld [vmem:[#allocation2] sm:$0xff]  ;;  %v807_v0 = vld [vmem:[#allocation2 + $0x8] sm:$0xff]  ;;  %v808_v1 = vld [vmem:[#allocation2 + $0x10] sm:$0xff] }
  0x7e   : > { %958 = vmatpush.msrb.mxu0 %v833_v43  ;;  %913 = vmatpush.msra.mxu2 %v827_v44  ;;  %v809_v2 = vld [vmem:[#allocation2 + $0x18] sm:$0xff]  ;;  %v994_v5 = vld [vmem:[#allocation5 + $0x70] sm:$0xff]  ;;  %v993_v7 = vld [vmem:[#allocation5 + $0x68] sm:$0xff] }
  0x7f   : > { %890 = vmatpush.msra.mxu1 %v826_v42  ;;  %936 = vmatpush.msra.mxu3 %v828_v45  ;;  %v995_v3 = vld [vmem:[#allocation5 + $0x78] sm:$0xff]  ;;  %v1042_v6 = vld [vmem:[#allocation5 + $0x1f0] sm:$0xff]  ;;  %v1041_v8 = vld [vmem:[#allocation5 + $0x1e8] sm:$0xff] }
  0x80   : > { %959 = vmatpush.msrb.mxu0 %v829_v47  ;;  %914 = vmatpush.msra.mxu2 %v823_v48  ;;  %v1043_v4 = vld [vmem:[#allocation5 + $0x1f8] sm:$0xff]  ;;  %v1010_v11 = vld [vmem:[#allocation5 + $0xf0] sm:$0xff]  ;;  %v992_v12 = vld [vmem:[#allocation5 + $0x60] sm:$0xff] }
  0x81   : > { %891 = vmatpush.msra.mxu1 %v822_v46  ;;  %937 = vmatpush.msra.mxu3 %v824_v49  ;;  %v1011_v9 = vld [vmem:[#allocation5 + $0xf8] sm:$0xff]  ;;  %v1040_v13 = vld [vmem:[#allocation5 + $0x1e0] sm:$0xff]  ;;  %v1026_v14 = vld [vmem:[#allocation5 + $0x170] sm:$0xff] }
  0x82   : > { %960 = vmatpush.msrb.mxu0 %v825_v51  ;;  %915 = vmatpush.msra.mxu2 %v819_v52  ;;  %v1027_v10 = vld [vmem:[#allocation5 + $0x178] sm:$0xff]  ;;  %v1009_v15 = vld [vmem:[#allocation5 + $0xe8] sm:$0xff]  ;;  %v1008_v19 = vld [vmem:[#allocation5 + $0xe0] sm:$0xff] }
  0x83   : > { %892 = vmatpush.msra.mxu1 %v818_v50  ;;  %938 = vmatpush.msra.mxu3 %v820_v53  ;;  %v1025_v16 = vld [vmem:[#allocation5 + $0x168] sm:$0xff]  ;;  %v991_v17 = vld [vmem:[#allocation5 + $0x58] sm:$0xff]  ;;  %v1024_v20 = vld [vmem:[#allocation5 + $0x160] sm:$0xff] }
  0x84   : > { %961 = vmatpush.msrb.mxu0 %v821_v55  ;;  %916 = vmatpush.msra.mxu2 %v815_v56  ;;  %v1039_v18 = vld [vmem:[#allocation5 + $0x1d8] sm:$0xff]  ;;  %v990_v21 = vld [vmem:[#allocation5 + $0x50] sm:$0xff]  ;;  %v989_v25 = vld [vmem:[#allocation5 + $0x48] sm:$0xff] }
  0x85   : > { %893 = vmatpush.msra.mxu1 %v814_v54  ;;  %939 = vmatpush.msra.mxu3 %v816_v57  ;;  %v1038_v22 = vld [vmem:[#allocation5 + $0x1d0] sm:$0xff]  ;;  %v1007_v23 = vld [vmem:[#allocation5 + $0xd8] sm:$0xff]  ;;  %v1037_v26 = vld [vmem:[#allocation5 + $0x1c8] sm:$0xff] }
  0x86   : > { %962 = vmatpush.msrb.mxu0 %v817_v58  ;;  %917 = vmatpush.msra.mxu2 %v811_v60  ;;  %v1023_v24 = vld [vmem:[#allocation5 + $0x158] sm:$0xff]  ;;  %v1006_v27 = vld [vmem:[#allocation5 + $0xd0] sm:$0xff]  ;;  %v988_v29 = vld [vmem:[#allocation5 + $0x40] sm:$0xff] }
  0x87   : > { %894 = vmatpush.msra.mxu1 %v810_v59  ;;  %940 = vmatpush.msra.mxu3 %v812_v61  ;;  %v1022_v28 = vld [vmem:[#allocation5 + $0x150] sm:$0xff]  ;;  %v1036_v30 = vld [vmem:[#allocation5 + $0x1c0] sm:$0xff]  ;;  %v1005_v31 = vld [vmem:[#allocation5 + $0xc8] sm:$0xff] }
  0x88   : > { %963 = vmatpush.msrb.mxu0 %v813_v62  ;;  %918 = vmatpush.msra.mxu2 %v807_v0  ;;  %v1021_v32 = vld [vmem:[#allocation5 + $0x148] sm:$0xff]  ;;  %v987_v33 = vld [vmem:[#allocation5 + $0x38] sm:$0xff]  ;;  %v1004_v35 = vld [vmem:[#allocation5 + $0xc0] sm:$0xff] }
  0x89   : > { %895 = vmatpush.msra.mxu1 %v806_v63  ;;  %941 = vmatpush.msra.mxu3 %v808_v1  ;;  %v1035_v34 = vld [vmem:[#allocation5 + $0x1b8] sm:$0xff]  ;;  %v1020_v36 = vld [vmem:[#allocation5 + $0x140] sm:$0xff]  ;;  %v986_v37 = vld [vmem:[#allocation5 + $0x30] sm:$0xff] }
  0x8a   : > { %964 = vmatpush.msrb.mxu0 %v809_v2  ;;  %1071 = vmatpush.msrb.mxu2 %v1011_v9  ;;  %v1034_v38 = vld [vmem:[#allocation5 + $0x1b0] sm:$0xff]  ;;  %v2427_v39 = vld [vmem:[%s3731_s18] ss:$0 sm:$0xff]  ;;  %v1003_v40 = vld [vmem:[#allocation5 + $0xb8] sm:$0xff] }
  0x8b   : > { %1048 = vmatpush.msrb.mxu1 %v995_v3  ;;  %1094 = vmatpush.msrb.mxu3 %v1027_v10  ;;  %v1019_v41 = vld [vmem:[#allocation5 + $0x138] sm:$0xff]  ;;  %v985_v42 = vld [vmem:[#allocation5 + $0x28] sm:$0xff]  ;;  %v1002_v44 = vld [vmem:[#allocation5 + $0xb0] sm:$0xff] }
  0x8c   : > { %1117 = vmatpush.msra.mxu0 %v1043_v4  ;;  %1072 = vmatpush.msrb.mxu2 %v1010_v11  ;;  %v1033_v43 = vld [vmem:[#allocation5 + $0x1a8] sm:$0xff]  ;;  %v1018_v45 = vld [vmem:[#allocation5 + $0x130] sm:$0xff]  ;;  %v984_v48 = vld [vmem:[#allocation5 + $0x20] sm:$0xff] }
  0x8d   : > { %1049 = vmatpush.msrb.mxu1 %v994_v5  ;;  %1095 = vmatpush.msrb.mxu3 %v1026_v14  ;;  %v1032_v49 = vld [vmem:[#allocation5 + $0x1a0] sm:$0xff]  ;;  %v983_v50 = vld [vmem:[#allocation5 + $0x18] sm:$0xff]  ;;  %v982_v54 = vld [vmem:[#allocation5 + $0x10] sm:$0xff] }
  0x8e   : > { %1118 = vmatpush.msra.mxu0 %v1042_v6  ;;  %1073 = vmatpush.msrb.mxu2 %v1009_v15  ;;  %v1031_v51 = vld [vmem:[#allocation5 + $0x198] sm:$0xff]  ;;  %v1001_v55 = vld [vmem:[#allocation5 + $0xa8] sm:$0xff]  ;;  %v1030_v57 = vld [vmem:[#allocation5 + $0x190] sm:$0xff] }
  0x8f   : > { %1050 = vmatpush.msrb.mxu1 %v993_v7  ;;  %1096 = vmatpush.msrb.mxu3 %v1025_v16  ;;  %v1017_v56 = vld [vmem:[#allocation5 + $0x128] sm:$0xff]  ;;  %v1000_v59 = vld [vmem:[#allocation5 + $0xa0] sm:$0xff]  ;;  %v999_v63 = vld [vmem:[#allocation5 + $0x98] sm:$0xff] }
  0x90   : > { %1119 = vmatpush.msra.mxu0 %v1041_v8  ;;  %1074 = vmatpush.msrb.mxu2 %v1008_v19  ;;  %v981_v58 = vld [vmem:[#allocation5 + $0x8] sm:$0xff]  ;;  %v1016_v60 = vld [vmem:[#allocation5 + $0x120] sm:$0xff]  ;;  %v1015_v0 = vld [vmem:[#allocation5 + $0x118] sm:$0xff] }
  0x91   : > { %1051 = vmatpush.msrb.mxu1 %v992_v12  ;;  %1097 = vmatpush.msrb.mxu3 %v1024_v20  ;;  %v1029_v61 = vld [vmem:[#allocation5 + $0x188] sm:$0xff]  ;;  %v980_v62 = vld [vmem:[#allocation5] sm:$0xff]  ;;  %v998_v2 = vld [vmem:[#allocation5 + $0x90] sm:$0xff] }
  0x92   : > { %1120 = vmatpush.msra.mxu0 %v1040_v13  ;;  %1075 = vmatpush.msrb.mxu2 %v1007_v23  ;;  %v1028_v1 = vld [vmem:[#allocation5 + $0x180] sm:$0xff]  ;;  %v1014_v3 = vld [vmem:[#allocation5 + $0x110] sm:$0xff]  ;;  %v997_v4 = vld [vmem:[#allocation5 + $0x88] sm:$0xff] }
  0x93   : > { %1052 = vmatpush.msrb.mxu1 %v991_v17  ;;  %1098 = vmatpush.msrb.mxu3 %v1023_v24  ;;  %v1013_v5 = vld [vmem:[#allocation5 + $0x108] sm:$0xff]  ;;  %v996_v6 = vld [vmem:[#allocation5 + $0x80] sm:$0xff] }
  0x94   : > { %1121 = vmatpush.msra.mxu0 %v1039_v18  ;;  %1076 = vmatpush.msrb.mxu2 %v1006_v27  ;;  %v1012_v7 = vld [vmem:[#allocation5 + $0x100] sm:$0xff] }
  0x95   : > { %1053 = vmatpush.msrb.mxu1 %v990_v21  ;;  %1099 = vmatpush.msrb.mxu3 %v1022_v28  ;;  %v870_v8 = vld [vmem:[%s3732_s3] sm:$0xf] }
  0x96   : > { %1122 = vmatpush.msra.mxu0 %v1038_v22  ;;  %1077 = vmatpush.msrb.mxu2 %v1005_v31  ;;  %v872_v9 = vperm.slane %v870_v8, 0  ;;  %v875_v10 = vperm.slane %v870_v8, 3  ;;  %v873_v16 = vperm.slane %v870_v8, 1  ;;  %v874_v18 = vperm.slane %v870_v8, 2 }
  0x97   : > { %1054 = vmatpush.msrb.mxu1 %v989_v25  ;;  %1100 = vmatpush.msrb.mxu3 %v1021_v32 }
  0x98   : > { %1123 = vmatpush.msra.mxu0 %v1037_v26  ;;  %1078 = vmatpush.msrb.mxu2 %v1004_v35 }
  0x99   : > { %1055 = vmatpush.msrb.mxu1 %v988_v29  ;;  %1101 = vmatpush.msrb.mxu3 %v1020_v36 }
  0x9a   : > { %1124 = vmatpush.msra.mxu0 %v1036_v30  ;;  %1079 = vmatpush.msrb.mxu2 %v1003_v40 }
  0x9b   : > { %1056 = vmatpush.msrb.mxu1 %v987_v33  ;;  %1102 = vmatpush.msrb.mxu3 %v1019_v41 }
  0x9c   : > { %1125 = vmatpush.msra.mxu0 %v1035_v34  ;;  %1080 = vmatpush.msrb.mxu2 %v1002_v44 }
  0x9d   : > { %1057 = vmatpush.msrb.mxu1 %v986_v37  ;;  %1103 = vmatpush.msrb.mxu3 %v1018_v45 }
  0x9e   : > { %1126 = vmatpush.msra.mxu0 %v1034_v38  ;;  %1081 = vmatpush.msrb.mxu2 %v1001_v55  ;;  %v2428_v38 = vld [vmem:[%s3733_s16] ss:$0 sm:$0xff] }
  0x9f   : > { %1058 = vmatpush.msrb.mxu1 %v985_v42  ;;  %1104 = vmatpush.msrb.mxu3 %v1017_v56 }
  0xa0   : > { %1127 = vmatpush.msra.mxu0 %v1033_v43  ;;  %1082 = vmatpush.msrb.mxu2 %v1000_v59 }
  0xa1   : > { %1059 = vmatpush.msrb.mxu1 %v984_v48  ;;  %1105 = vmatpush.msrb.mxu3 %v1016_v60 }
  0xa2   : > { %1128 = vmatpush.msra.mxu0 %v1032_v49  ;;  %1083 = vmatpush.msrb.mxu2 %v999_v63 }
  0xa3   : > { %1060 = vmatpush.msrb.mxu1 %v983_v50  ;;  %1106 = vmatpush.msrb.mxu3 %v1015_v0 }
  0xa4   : > { %1129 = vmatpush.msra.mxu0 %v1031_v51  ;;  %1084 = vmatpush.msrb.mxu2 %v998_v2 }
  0xa5   : > { %1061 = vmatpush.msrb.mxu1 %v982_v54  ;;  %1107 = vmatpush.msrb.mxu3 %v1014_v3 }
  0xa6   : > { %1130 = vmatpush.msra.mxu0 %v1030_v57  ;;  %1085 = vmatpush.msrb.mxu2 %v997_v4 }
  0xa7   : > { %1062 = vmatpush.msrb.mxu1 %v981_v58  ;;  %1108 = vmatpush.msrb.mxu3 %v1013_v5 }
  0xa8   : > { %1131 = vmatpush.msra.mxu0 %v1029_v61  ;;  %1086 = vmatpush.msrb.mxu2 %v996_v6 }
  0xa9   : > { %1063 = vmatpush.msrb.mxu1 %v980_v62  ;;  %1109 = vmatpush.msrb.mxu3 %v1012_v7 }
  0xaa   : > { %1132 = vmatpush.msra.mxu0 %v1028_v1 }
  0xe7   : > { %v800_v46 = vpop.f32.mrf.mxu0 }
  0xe8   : > { %v801_v47 = vadd.f32 %v2427_v39, %v800_v46 }
  0xea   : > { %896 = vmatmul.f32.vlgmr.msra.gmra.mxu1 %v801_v47  ;;  %919 = vmatmul.f32.vlgmr.msra.gmra.mxu2 %v801_v47 }
  0xeb   : > { %942 = vmatmul.f32.vlgmr.msra.gmra.mxu3 %v801_v47  ;;  %965 = vmatmul.f32.vlgmr.msrb.gmra.mxu0 %v801_v47 }
  0xef   : > { %v803_v52 = vpop.f32.mrf.mxu0 }
  0xf0   : > { %v804_v53 = vadd.f32 %v2427_v39, %v803_v52 }
  0xf2   : > { %899 = vmatmul.f32.gmra.mxu1 %v804_v53  ;;  %922 = vmatmul.f32.gmra.mxu2 %v804_v53 }
  0xf3   : > { %945 = vmatmul.f32.gmra.mxu3 %v804_v53  ;;  %968 = vmatmul.f32.gmra.mxu0 %v804_v53 }
 0x167   : > { %v897_v11 = vpop.f32.mrf.mxu1 }
 0x168   : > { %v898_v12 = vadd.f32 %v897_v11, %v872_v9  ;;  %v966_v13 = vpop.f32.mrf.mxu0 }
 0x169   : > { %v967_v14 = vadd.f32 %v966_v13, %v875_v10 }
 0x16a   : > { %v972_v15 = vmax.f32 %v898_v12, 0.0 }
 0x16b   : > { %v975_v17 = vmax.f32 %v967_v14, 0.0 }
 0x16c   : > { %1064 = vmatmul.f32.vlgmr.msrb.gmra.mxu1 %v972_v15 }
 0x16d   : > { %1133 = vmatmul.f32.vlgmr.msra.gmra.mxu0 %v975_v17  ;;  %v920_v19 = vpop.f32.mrf.mxu2 }
 0x16e   : > { %v921_v20 = vadd.f32 %v920_v19, %v873_v16  ;;  %v943_v21 = vpop.f32.mrf.mxu3 }
 0x16f   : > { %v944_v22 = vadd.f32 %v943_v21, %v874_v18  ;;  %v900_v23 = vpop.f32.mrf.mxu1 }
 0x170   : > { %v973_v24 = vmax.f32 %v921_v20, 0.0  ;;  %v901_v25 = vadd.f32 %v900_v23, %v872_v9  ;;  %v969_v26 = vpop.f32.mrf.mxu0 }
 0x171   : > { %v974_v27 = vmax.f32 %v944_v22, 0.0  ;;  %v970_v28 = vadd.f32 %v969_v26, %v875_v10 }
 0x172   : > { %v976_v29 = vmax.f32 %v901_v25, 0.0  ;;  %1087 = vmatmul.f32.vlgmr.msrb.gmra.mxu2 %v973_v24 }
 0x173   : > { %v979_v30 = vmax.f32 %v970_v28, 0.0  ;;  %1110 = vmatmul.f32.vlgmr.msrb.gmra.mxu3 %v974_v27 }
 0x174   : > { %1067 = vmatmul.f32.gmra.mxu1 %v976_v29 }
 0x175   : > { %1136 = vmatmul.f32.gmra.mxu0 %v979_v30  ;;  %v923_v31 = vpop.f32.mrf.mxu2 }
 0x176   : > { %v924_v32 = vadd.f32 %v923_v31, %v873_v16  ;;  %v946_v33 = vpop.f32.mrf.mxu3 }
 0x177   : > { %v947_v34 = vadd.f32 %v946_v33, %v874_v18 }
 0x178   : > { %v977_v35 = vmax.f32 %v924_v32, 0.0 }
 0x179   : > { %v978_v36 = vmax.f32 %v947_v34, 0.0 }
 0x17a   : > { %1090 = vmatmul.f32.gmra.mxu2 %v977_v35 }
 0x17b   : > { %1113 = vmatmul.f32.gmra.mxu3 %v978_v36 }
 0x1e9   : > { %v1065_v37 = vpop.f32.mrf.mxu1 }
 0x1ea   : > { %v1066_v39 = vadd.f32 %v2428_v38, %v1065_v37  ;;  %v1134_v43 = vpop.f32.mrf.mxu0 }
 0x1f1   : > { %v1068_v45 = vpop.f32.mrf.mxu1 }
 0x1f2   : > { %v1069_v47 = vadd.f32 %v2428_v38, %v1068_v45  ;;  %v1137_v52 = vpop.f32.mrf.mxu0 }
 0x1f5   : > { %v1088_v40 = vpop.f32.mrf.mxu2 }
 0x1f6   : > { %v1089_v41 = vadd.f32 %v1088_v40, %v1066_v39  ;;  %v1111_v42 = vpop.f32.mrf.mxu3 }
 0x1f8   : > { %v1112_v44 = vadd.f32 %v1111_v42, %v1089_v41 }
 0x1fa   : > { %v1135_v46 = vadd.f32 %v1134_v43, %v1112_v44 }
 0x1fc   : > { %1140 = vst [vmem:[%s3049_s17] sm:$0xff] %v1135_v46 }
 0x1fd   : > { %v1091_v48 = vpop.f32.mrf.mxu2 }
 0x1fe   : > { %v1092_v49 = vadd.f32 %v1091_v48, %v1069_v47  ;;  %v1114_v50 = vpop.f32.mrf.mxu3 }
 0x200   : > { %v1115_v51 = vadd.f32 %v1114_v50, %v1092_v49 }
 0x202   : > { %v1138_v53 = vadd.f32 %v1137_v52, %v1115_v51 }
 0x204   : > { %1141 = vst [vmem:[%s3049_s17 + $0x8] sm:$0xff] %v1138_v53 }
 0x205 PF: > { %v3071_v54 = vld [vmem:[%s3049_s17] sm:$0xff]  ;;  %v2738_v56 = vmov 128.0   ;;  %v2739_v25 = vmov 8.0   ;;  %s3734_s24 = sld [smem:[#allocation33_spill]] }
 0x206   : > { %1146 = vadd.xlane.f32.xlu0 %v3071_v54  ;;  %2434 = vrcp.f32 %v2738_v56  ;;  %v2430_v39 = vld [vmem:[%s746_s14] ss:$0 sm:$0xff] }
 0x20b   : > { %v3075_v55 = vld [vmem:[%s3049_s17 + $0x8] sm:$0xff]  ;;  %s3735_s2 = scalar_lea.vmem %s3734_s24, %s3014_s20  ;;  %s3752_s20 = sld [smem:[#allocation17_spill]] }
 0x20c   : > { %v2435_v57 = vpop.eup %2434  ;;  %v2429_v33 = vld [vmem:[%s3735_s2] ss:$0 sm:$0xff] }
 0x20d   : > { %v1151_v58 = vmul.f32 128.0, %v2435_v57  ;;  %vm1155_vm2 = vweird.f32 %v2435_v57 }
 0x20e   : > { %1148 = vadd.xlane.f32.xlu0 %v3075_v55 }
 0x20f   : > { %v1152_v59 = vsub.f32 1.0, %v1151_v58 }
 0x211   : > { %v1153_v60 = vmul.f32 %v2435_v57, %v1152_v59  ;;  %p2281_p13 = scmp.ge.s32.totalorder %s3752_s20, 1 }
 0x213   : > { %v1154_v61 = vadd.f32 %v2435_v57, %v1153_v60 }
 0x215   : > { %v3078_v62 = vsel %vm1155_vm2, %v2435_v57, %v1154_v61 }
 0x279   : > { %v1147_v63 = vpop.xlane.xlu0 %1146 }
 0x27a   : > { %v1157_v0 = vmul.f32 %v3078_v62, %v1147_v63 }
 0x27c   : > { %v1159_v1 = vsub.f32 %v3071_v54, %v1157_v0 }
 0x27e   : > { %v1161_v2 = vmul.f32 %v1159_v1, %v1159_v1 }
 0x280   : > { %1163 = vadd.xlane.f32.xlu1 %v1161_v2 }
 0x281   : > { %v1149_v3 = vpop.xlane.xlu0 %1148 }
 0x282   : > { %v1158_v4 = vmul.f32 %v3078_v62, %v1149_v3 }
 0x284   : > { %v1160_v5 = vsub.f32 %v3075_v55, %v1158_v4 }
 0x286   : > { %v1162_v6 = vmul.f32 %v1160_v5, %v1160_v5 }
 0x288   : > { %1165 = vadd.xlane.f32.xlu1 %v1162_v6 }
 0x2f3   : > { %v1164_v7 = vpop.xlane.xlu1 %1163 }
 0x2f4   : > { %v1167_v8 = vmul.f32 0.007874016, %v1164_v7 }
 0x2f6   : > { %2436 = vrsqrt.f32 %v1167_v8  ;;  %vm1176_vm3 = vcmp.eq.f32.partialorder %v1167_v8, inf  ;;  %v1179_v21 = vand.u32 2147483648, %v1167_v8  ;;  %vm1178_vm4 = vcmp.eq.f32.partialorder %v1167_v8, 0.0 }
 0x2fb   : > { %v1166_v9 = vpop.xlane.xlu1 %1165 }
 0x2fc   : > { %v2437_v10 = vpop.eup %2436  ;;  %v1168_v11 = vmul.f32 0.007874016, %v1166_v9 }
 0x2fd   : > { %v1170_v12 = vmul.f32 %v2437_v10, %v1167_v8 }
 0x2fe   : > { %2438 = vrsqrt.f32 %v1168_v11  ;;  %vm1188_vm5 = vcmp.eq.f32.partialorder %v1168_v11, inf  ;;  %v1191_v31 = vand.u32 2147483648, %v1168_v11  ;;  %vm1190_vm6 = vcmp.eq.f32.partialorder %v1168_v11, 0.0 }
 0x2ff   : > { %v1171_v13 = vmul.f32 %v2437_v10, %v1170_v12  ;;  %2440 = vrcp.f32 %v2739_v25  ;;  %v1351_v12 = vld [vmem:[%s3002_s15 + $0x1e8] sm:$0xff]  ;;  %v1340_v25 = vld [vmem:[%s3002_s15 + $0x190] sm:$0xff] }
 0x300   : > { %1387 = vmatpush.msra.mxu1 %v1351_v12  ;;  %v1296_v12 = vld [vmem:[%s3002_s15 + $0x30] sm:$0xff] }
 0x301   : > { %v1172_v14 = vmul.f32 0.5, %v1171_v13  ;;  %v1352_v13 = vld [vmem:[%s3002_s15 + $0x1f0] sm:$0xff] }
 0x302   : > { %1410 = vmatpush.msra.mxu2 %v1352_v13  ;;  %v1297_v13 = vld [vmem:[%s3002_s15 + $0x38] sm:$0xff] }
 0x303   : > { %v1173_v15 = vsub.f32 1.5, %v1172_v14  ;;  %v1353_v14 = vld [vmem:[%s3002_s15 + $0x1f8] sm:$0xff] }
 0x304   : > { %v2439_v16 = vpop.eup %2438  ;;  %1433 = vmatpush.msra.mxu3 %v1353_v14  ;;  %v1290_v14 = vld [vmem:[%s3002_s15] sm:$0xff] }
 0x305   : > { %v1174_v17 = vmul.f32 %v2437_v10, %v1173_v15  ;;  %v1182_v18 = vmul.f32 %v2439_v16, %v1168_v11  ;;  %v2441_v30 = vpop.eup %2440  ;;  %v1346_v15 = vld [vmem:[%s3002_s15 + $0x1c0] sm:$0xff] }
 0x306   : > { %v1222_v36 = vmul.f32 8.0, %v2441_v30  ;;  %vm1226_vm7 = vweird.f32 %v2441_v30 }
 0x307   : > { %v1175_v19 = vmul.f32 %v1174_v17, %v1167_v8  ;;  %v1183_v20 = vmul.f32 %v2439_v16, %v1182_v18  ;;  %v1348_v17 = vld [vmem:[%s3002_s15 + $0x1d0] sm:$0xff]  ;;  %v1349_v18 = vld [vmem:[%s3002_s15 + $0x1d8] sm:$0xff] }
 0x308   : > { %v1223_v41 = vsub.f32 1.0, %v1222_v36  ;;  %1411 = vmatpush.msra.mxu2 %v1348_v17  ;;  %1434 = vmatpush.msra.mxu3 %v1349_v18  ;;  %v1327_v36 = vld [vmem:[%s3002_s15 + $0x128] sm:$0xff]  ;;  %v1293_v17 = vld [vmem:[%s3002_s15 + $0x18] sm:$0xff] }
 0x309   : > { %v1177_v22 = vsel %vm1176_vm3, %v1167_v8, %v1175_v19  ;;  %v1184_v23 = vmul.f32 0.5, %v1183_v20  ;;  %v1342_v19 = vld [vmem:[%s3002_s15 + $0x1a0] sm:$0xff]  ;;  %v1343_v20 = vld [vmem:[%s3002_s15 + $0x1a8] sm:$0xff] }
 0x30a   : > { %v1180_v24 = vsel %vm1178_vm4, %v1179_v21, %v1177_v22  ;;  %v1224_v45 = vmul.f32 %v2441_v30, %v1223_v41  ;;  %v1344_v21 = vld [vmem:[%s3002_s15 + $0x1b0] sm:$0xff]  ;;  %v1345_v22 = vld [vmem:[%s3002_s15 + $0x1b8] sm:$0xff] }
 0x30b   : > { %v1185_v26 = vsub.f32 1.5, %v1184_v23  ;;  %v1193_v27 = vadd.f32 1e-06, %v1180_v24  ;;  %1412 = vmatpush.msra.mxu2 %v1344_v21  ;;  %1435 = vmatpush.msra.mxu3 %v1345_v22  ;;  %v1338_v23 = vld [vmem:[%s3002_s15 + $0x180] sm:$0xff]  ;;  %v1339_v24 = vld [vmem:[%s3002_s15 + $0x188] sm:$0xff]  ;;  %v1324_v41 = vld [vmem:[%s3002_s15 + $0x110] sm:$0xff] }
 0x30c   : > { %v1225_v50 = vadd.f32 %v2441_v30, %v1224_v45  ;;  %v1320_v45 = vld [vmem:[%s3002_s15 + $0xf0] sm:$0xff] }
 0x30d   : > { %v1186_v28 = vmul.f32 %v2439_v16, %v1185_v26  ;;  %2442 = vrcp.f32 %v1193_v27  ;;  %v1347_v16 = vld [vmem:[%s3002_s15 + $0x1c8] sm:$0xff]  ;;  %v1341_v26 = vld [vmem:[%s3002_s15 + $0x198] sm:$0xff]  ;;  %1413 = vmatpush.msra.mxu2 %v1340_v25  ;;  %v1334_v27 = vld [vmem:[%s3002_s15 + $0x160] sm:$0xff] }
 0x30e   : > { %v1227_v57 = vsel %vm1226_vm7, %v2441_v30, %v1225_v50  ;;  %1388 = vmatpush.msra.mxu1 %v1347_v16  ;;  %1436 = vmatpush.msra.mxu3 %v1341_v26  ;;  %v1337_v30 = vld [vmem:[%s3002_s15 + $0x178] sm:$0xff]  ;;  %v1292_v16 = vld [vmem:[%s3002_s15 + $0x10] sm:$0xff] }
 0x30f   : > { %v1187_v29 = vmul.f32 %v1186_v28, %v1168_v11  ;;  %v1335_v28 = vld [vmem:[%s3002_s15 + $0x168] sm:$0xff]  ;;  %v1317_v50 = vld [vmem:[%s3002_s15 + $0xd8] sm:$0xff] }
 0x310   : > { %1389 = vmatpush.msra.mxu1 %v1343_v20  ;;  %1437 = vmatpush.msra.mxu3 %v1337_v30 }
 0x311   : > { %v1189_v32 = vsel %vm1188_vm5, %v1168_v11, %v1187_v29  ;;  %v1350_v11 = vld [vmem:[%s3002_s15 + $0x1e0] sm:$0xff]  ;;  %v1336_v29 = vld [vmem:[%s3002_s15 + $0x170] sm:$0xff] }
 0x312   : > { %v1192_v34 = vsel %vm1190_vm6, %v1191_v31, %v1189_v32  ;;  %1364 = vmatpush.msra.mxu0 %v1350_v11  ;;  %1390 = vmatpush.msra.mxu1 %v1339_v24  ;;  %v1330_v31 = vld [vmem:[%s3002_s15 + $0x140] sm:$0xff]  ;;  %v1331_v32 = vld [vmem:[%s3002_s15 + $0x148] sm:$0xff] }
 0x313   : > { %v2443_v35 = vpop.eup %2442  ;;  %v1194_v37 = vadd.f32 1e-06, %v1192_v34  ;;  %1414 = vmatpush.msra.mxu2 %v1336_v29  ;;  %v1333_v34 = vld [vmem:[%s3002_s15 + $0x158] sm:$0xff]  ;;  %v1295_v11 = vld [vmem:[%s3002_s15 + $0x28] sm:$0xff] }
 0x314   : > { %v1197_v38 = vmul.f32 %v2443_v35, %v1159_v1  ;;  %1365 = vmatpush.msra.mxu0 %v1346_v15  ;;  %1391 = vmatpush.msra.mxu1 %v1335_v28  ;;  %v1326_v35 = vld [vmem:[%s3002_s15 + $0x120] sm:$0xff]  ;;  %v1291_v15 = vld [vmem:[%s3002_s15 + $0x8] sm:$0xff] }
 0x315   : > { %2444 = vrcp.f32 %v1194_v37  ;;  %1438 = vmatpush.msra.mxu3 %v1333_v34  ;;  %v1328_v37 = vld [vmem:[%s3002_s15 + $0x130] sm:$0xff] }
 0x316   : > { %v1202_v40 = vmul.f32 %v2429_v33, %v1197_v38  ;;  %1366 = vmatpush.msra.mxu0 %v1342_v19  ;;  %1392 = vmatpush.msra.mxu1 %v1331_v32  ;;  %v1329_v38 = vld [vmem:[%s3002_s15 + $0x138] sm:$0xff] }
 0x317   : > { %1439 = vmatpush.msra.mxu3 %v1329_v38 }
 0x318   : > { %v1207_v42 = vadd.f32 %v2430_v39, %v1202_v40  ;;  %1367 = vmatpush.msra.mxu0 %v1338_v23  ;;  %1393 = vmatpush.msra.mxu1 %v1327_v36  ;;  %v1323_v40 = vld [vmem:[%s3002_s15 + $0x108] sm:$0xff] }
 0x31a   : > { %v1209_v43 = vrot.slane %v1207_v42, 4  ;;  %1368 = vmatpush.msra.mxu0 %v1334_v27  ;;  %1394 = vmatpush.msra.mxu1 %v1323_v40  ;;  %v2431_v40 = vld [vmem:[%s749_s30] ss:$0 sm:$0xff] }
 0x31b   : > { %v2445_v44 = vpop.eup %2444 }
 0x31c   : > { %v1210_v46 = vadd.f32 %v1209_v43, %v1207_v42  ;;  %v1198_v47 = vmul.f32 %v2445_v44, %v1160_v5  ;;  %1369 = vmatpush.msra.mxu0 %v1330_v31  ;;  %v1325_v42 = vld [vmem:[%s3002_s15 + $0x118] sm:$0xff]  ;;  %v1318_v43 = vld [vmem:[%s3002_s15 + $0xe0] sm:$0xff]  ;;  %v1319_v44 = vld [vmem:[%s3002_s15 + $0xe8] sm:$0xff] }
 0x31d   : > { %1440 = vmatpush.msra.mxu3 %v1325_v42  ;;  %1395 = vmatpush.msra.mxu1 %v1319_v44 }
 0x31e   : > { %v1211_v48 = vrot.slane %v1210_v46, 2  ;;  %v1203_v49 = vmul.f32 %v2429_v33, %v1198_v47  ;;  %v1332_v33 = vld [vmem:[%s3002_s15 + $0x150] sm:$0xff]  ;;  %1370 = vmatpush.msra.mxu0 %v1326_v35  ;;  %v1314_v47 = vld [vmem:[%s3002_s15 + $0xc0] sm:$0xff] }
 0x31f   : > { %1415 = vmatpush.msra.mxu2 %v1332_v33 }
 0x320   : > { %v1212_v51 = vadd.f32 %v1211_v48, %v1210_v46  ;;  %v1208_v52 = vadd.f32 %v2430_v39, %v1203_v49  ;;  %v1322_v39 = vld [vmem:[%s3002_s15 + $0x100] sm:$0xff]  ;;  %v1321_v46 = vld [vmem:[%s3002_s15 + $0xf8] sm:$0xff]  ;;  %v1315_v48 = vld [vmem:[%s3002_s15 + $0xc8] sm:$0xff] }
 0x321   : > { %1416 = vmatpush.msra.mxu2 %v1328_v37  ;;  %1371 = vmatpush.msra.mxu0 %v1322_v39  ;;  %v1316_v49 = vld [vmem:[%s3002_s15 + $0xd0] sm:$0xff] }
 0x322   : > { %v1213_v53 = vrot.slane %v1212_v51, 1  ;;  %v1215_v56 = vrot.slane %v1208_v52, 4  ;;  %1441 = vmatpush.msra.mxu3 %v1321_v46  ;;  %1396 = vmatpush.msra.mxu1 %v1315_v48 }
 0x323   : > { %1417 = vmatpush.msra.mxu2 %v1324_v41  ;;  %1372 = vmatpush.msra.mxu0 %v1318_v43 }
 0x324   : > { %v1214_v58 = vadd.f32 %v1213_v53, %v1212_v51  ;;  %v1216_v59 = vadd.f32 %v1215_v56, %v1208_v52  ;;  %1442 = vmatpush.msra.mxu3 %v1317_v50  ;;  %v1310_v51 = vld [vmem:[%s3002_s15 + $0xa0] sm:$0xff]  ;;  %v1311_v52 = vld [vmem:[%s3002_s15 + $0xa8] sm:$0xff]  ;;  %v1312_v53 = vld [vmem:[%s3002_s15 + $0xb0] sm:$0xff] }
 0x325   : > { %1418 = vmatpush.msra.mxu2 %v1320_v45  ;;  %1373 = vmatpush.msra.mxu0 %v1314_v47  ;;  %v1313_v56 = vld [vmem:[%s3002_s15 + $0xb8] sm:$0xff]  ;;  %v2432_v45 = vld [vmem:[%s752_s29] ss:$0 sm:$0xff] }
 0x326   : > { %v1228_v60 = vmul.f32 %v1227_v57, %v1214_v58  ;;  %v1217_v61 = vrot.slane %v1216_v59, 2  ;;  %1397 = vmatpush.msra.mxu1 %v1311_v52  ;;  %v1307_v58 = vld [vmem:[%s3002_s15 + $0x88] sm:$0xff]  ;;  %1443 = vmatpush.msra.mxu3 %v1313_v56 }
 0x327   : > { %1419 = vmatpush.msra.mxu2 %v1316_v49  ;;  %1374 = vmatpush.msra.mxu0 %v1310_v51 }
 0x328   : > { %v3095_v63 = vadd.f32 %v1228_v60, %v3071_v54  ;;  %v1218_v0 = vadd.f32 %v1217_v61, %v1216_v59  ;;  %v1308_v59 = vld [vmem:[%s3002_s15 + $0x90] sm:$0xff]  ;;  %v1309_v60 = vld [vmem:[%s3002_s15 + $0x98] sm:$0xff]  ;;  %v1302_v61 = vld [vmem:[%s3002_s15 + $0x60] sm:$0xff]  ;;  %1398 = vmatpush.msra.mxu1 %v1307_v58 }
 0x329   : > { %1420 = vmatpush.msra.mxu2 %v1312_v53  ;;  %1444 = vmatpush.msra.mxu3 %v1309_v60 }
 0x32a   : > { %1234 = vadd.xlane.f32.xlu2 %v3095_v63  ;;  %v1219_v1 = vrot.slane %v1218_v0, 1 }
 0x32b   : > { %1421 = vmatpush.msra.mxu2 %v1308_v59 }
 0x32c   : > { %v1220_v2 = vadd.f32 %v1219_v1, %v1218_v0  ;;  %v1303_v0 = vld [vmem:[%s3002_s15 + $0x68] sm:$0xff]  ;;  %v1304_v1 = vld [vmem:[%s3002_s15 + $0x70] sm:$0xff] }
 0x32d   : > { %1399 = vmatpush.msra.mxu1 %v1303_v0  ;;  %1422 = vmatpush.msra.mxu2 %v1304_v1 }
 0x32e   : > { %v1229_v3 = vmul.f32 %v1227_v57, %v1220_v2  ;;  %v1306_v57 = vld [vmem:[%s3002_s15 + $0x80] sm:$0xff]  ;;  %v1305_v2 = vld [vmem:[%s3002_s15 + $0x78] sm:$0xff] }
 0x32f   : > { %1375 = vmatpush.msra.mxu0 %v1306_v57  ;;  %1445 = vmatpush.msra.mxu3 %v1305_v2 }
 0x330   : > { %v3099_v4 = vadd.f32 %v1229_v3, %v3075_v55  ;;  %v1298_v3 = vld [vmem:[%s3002_s15 + $0x40] sm:$0xff] }
 0x331   : > { %1376 = vmatpush.msra.mxu0 %v1302_v61 }
 0x332   : > { %1236 = vadd.xlane.f32.xlu2 %v3099_v4 }
 0x333   : > { %1377 = vmatpush.msra.mxu0 %v1298_v3 }
 0x39d   : > { %v1235_v5 = vpop.xlane.xlu2 %1234 }
 0x39e   : > { %v1238_v6 = vmul.f32 %v1235_v5, %v3078_v62  ;;  %v1299_v5 = vld [vmem:[%s3002_s15 + $0x48] sm:$0xff] }
 0x39f   : > { %1400 = vmatpush.msra.mxu1 %v1299_v5 }
 0x3a0   : > { %v3104_v54 = vsub.f32 %v3095_v63, %v1238_v6 }
 0x3a1   : > { %1401 = vmatpush.msra.mxu1 %v1295_v11 }
 0x3a2   : > { %v1242_v7 = vmul.f32 %v3104_v54, %v3104_v54 }
 0x3a3   : > { %1402 = vmatpush.msra.mxu1 %v1291_v15 }
 0x3a4   : > { %1244 = vadd.xlane.f32.xlu0 %v1242_v7  ;;  %v1300_v7 = vld [vmem:[%s3002_s15 + $0x50] sm:$0xff] }
 0x3a5   : > { %v1237_v8 = vpop.xlane.xlu2 %1236  ;;  %1423 = vmatpush.msra.mxu2 %v1300_v7 }
 0x3a6   : > { %v1239_v55 = vmul.f32 %v1237_v8, %v3078_v62  ;;  %v1301_v8 = vld [vmem:[%s3002_s15 + $0x58] sm:$0xff] }
 0x3a7   : > { %1446 = vmatpush.msra.mxu3 %v1301_v8  ;;  %1424 = vmatpush.msra.mxu2 %v1296_v12 }
 0x3a8   : > { %v3110_v9 = vsub.f32 %v3099_v4, %v1239_v55 }
 0x3a9   : > { %1447 = vmatpush.msra.mxu3 %v1297_v13  ;;  %1425 = vmatpush.msra.mxu2 %v1292_v16 }
 0x3aa   : > { %v1243_v10 = vmul.f32 %v3110_v9, %v3110_v9 }
 0x3ab   : > { %1448 = vmatpush.msra.mxu3 %v1293_v17 }
 0x3ac   : > { %1246 = vadd.xlane.f32.xlu1 %v1243_v10  ;;  %v1294_v10 = vld [vmem:[%s3002_s15 + $0x20] sm:$0xff] }
 0x3ad   : > { %1378 = vmatpush.msra.mxu0 %v1294_v10 }
 0x3af   : > { %1379 = vmatpush.msra.mxu0 %v1290_v14 }
 0x417   : > { %v1245_v6 = vpop.xlane.xlu0 %1244 }
 0x418   : > { %v1248_v55 = vmul.f32 0.007874016, %v1245_v6 }
 0x41a   : > { %2446 = vrsqrt.f32 %v1248_v55  ;;  %vm1257_vm8 = vcmp.eq.f32.partialorder %v1248_v55, inf  ;;  %v1260_v30 = vand.u32 2147483648, %v1248_v55  ;;  %vm1259_vm9 = vcmp.eq.f32.partialorder %v1248_v55, 0.0 }
 0x41f   : > { %v1247_v18 = vpop.xlane.xlu1 %1246 }
 0x420   : > { %v2447_v19 = vpop.eup %2446  ;;  %v1249_v20 = vmul.f32 0.007874016, %v1247_v18 }
 0x421   : > { %v1251_v21 = vmul.f32 %v2447_v19, %v1248_v55 }
 0x422   : > { %2448 = vrsqrt.f32 %v1249_v20  ;;  %vm1269_vm10 = vcmp.eq.f32.partialorder %v1249_v20, inf  ;;  %v1272_v38 = vand.u32 2147483648, %v1249_v20  ;;  %vm1271_vm11 = vcmp.eq.f32.partialorder %v1249_v20, 0.0 }
 0x423   : > { %v1252_v22 = vmul.f32 %v2447_v19, %v1251_v21 }
 0x425   : > { %v1253_v23 = vmul.f32 0.5, %v1252_v22 }
 0x427   : > { %v1254_v24 = vsub.f32 1.5, %v1253_v23 }
 0x428   : > { %v2449_v25 = vpop.eup %2448 }
 0x429   : > { %v1255_v26 = vmul.f32 %v2447_v19, %v1254_v24  ;;  %v1263_v27 = vmul.f32 %v2449_v25, %v1249_v20 }
 0x42b   : > { %v1256_v28 = vmul.f32 %v1255_v26, %v1248_v55  ;;  %v1264_v29 = vmul.f32 %v2449_v25, %v1263_v27 }
 0x42d   : > { %v1265_v31 = vmul.f32 0.5, %v1264_v29  ;;  %v1258_v32 = vsel %vm1257_vm8, %v1248_v55, %v1256_v28 }
 0x42e   : > { %v1261_v33 = vsel %vm1259_vm9, %v1260_v30, %v1258_v32 }
 0x42f   : > { %v1266_v34 = vsub.f32 1.5, %v1265_v31  ;;  %v1274_v35 = vadd.f32 1e-06, %v1261_v33 }
 0x431   : > { %v1267_v36 = vmul.f32 %v2449_v25, %v1266_v34  ;;  %2450 = vrcp.f32 %v1274_v35 }
 0x433   : > { %v1268_v37 = vmul.f32 %v1267_v36, %v1249_v20 }
 0x435   : > { %v1270_v39 = vsel %vm1269_vm10, %v1249_v20, %v1268_v37 }
 0x436   : > { %v1273_v41 = vsel %vm1271_vm11, %v1272_v38, %v1270_v39 }
 0x437   : > { %v2451_v42 = vpop.eup %2450  ;;  %v1275_v43 = vadd.f32 1e-06, %v1273_v41 }
 0x438   : > { %v1278_v44 = vmul.f32 %v2451_v42, %v3104_v54  ;;  %v3191_v54 = vld [vmem:[%s3041_s4] sm:$0xf] }
 0x439   : > { %2452 = vrcp.f32 %v1275_v43  ;;  %v1356_v52 = vperm.slane %v3191_v54, 0  ;;  %v1357_v53 = vperm.slane %v3191_v54, 1  ;;  %v1358_v61 = vperm.slane %v3191_v54, 2 }
 0x43a   : > { %v1283_v46 = vmul.f32 %v2431_v40, %v1278_v44  ;;  %v1359_v0 = vperm.slane %v3191_v54, 3 }
 0x43c   : > { %v1288_v47 = vadd.f32 %v2432_v45, %v1283_v46 }
 0x43e   : > { %1380 = vmatmul.f32.vlgmr.msra.gmra.mxu0 %v1288_v47  ;;  %1403 = vmatmul.f32.vlgmr.msra.gmra.mxu1 %v1288_v47 }
 0x43f   : > { %v2453_v48 = vpop.eup %2452  ;;  %1426 = vmatmul.f32.vlgmr.msra.gmra.mxu2 %v1288_v47  ;;  %1449 = vmatmul.f32.vlgmr.msra.gmra.mxu3 %v1288_v47 }
 0x440   : > { %v1279_v49 = vmul.f32 %v2453_v48, %v3110_v9 }
 0x442   : > { %v1284_v50 = vmul.f32 %v2431_v40, %v1279_v49 }
 0x444   : > { %v1289_v51 = vadd.f32 %v2432_v45, %v1284_v50 }
 0x446   : > { %1383 = vmatmul.f32.gmra.mxu0 %v1289_v51  ;;  %1406 = vmatmul.f32.gmra.mxu1 %v1289_v51 }
 0x447   : > { %1429 = vmatmul.f32.gmra.mxu2 %v1289_v51  ;;  %1452 = vmatmul.f32.gmra.mxu3 %v1289_v51 }
 0x4bb   : > { %v1381_v56 = vpop.f32.mrf.mxu0  ;;  %v1404_v57 = vpop.f32.mrf.mxu1 }
 0x4bc   : > { %v3195_v58 = vadd.f32 %v1381_v56, %v1356_v52  ;;  %v3199_v59 = vadd.f32 %v1404_v57, %v1357_v53  ;;  %v1823_v57 = vld [vmem:[%s3047_s0 + $0x78] sm:$0xff] }
 0x4bd   : > { %1876 = vmatpush.msrb.mxu0 %v1823_v57 }
 0x4be   : > { %v3202_v9 = vmul.f32 0.70710677, %v3195_v58  ;;  %v3205_v60 = vmul.f32 0.70710677, %v3199_v59 }
 0x4c0   : > { %v1472_v1 = vmul.f32 %v3202_v9, %v3202_v9  ;;  %v1512_v2 = vmul.f32 %v3205_v60, %v3205_v60 }
 0x4c2   : > { %v3213_v3 = vmin.f32 %v1472_v1, 16.0  ;;  %v3215_v5 = vmin.f32 %v1512_v2, 16.0  ;;  %v1427_v6 = vpop.f32.mrf.mxu2  ;;  %v1450_v7 = vpop.f32.mrf.mxu3 }
 0x4c3   : > { %v3219_v8 = vadd.f32 %v1427_v6, %v1358_v61  ;;  %v3223_v55 = vadd.f32 %v1450_v7, %v1359_v0  ;;  %v1384_v33 = vpop.f32.mrf.mxu0 }
 0x4c4   : > { %v1474_v10 = vmul.f32 2.1237322e-06, %v3213_v3  ;;  %v1485_v11 = vmul.f32 3.8918573e-05, %v3213_v3  ;;  %v1514_v12 = vmul.f32 2.1237322e-06, %v3215_v5  ;;  %v3253_v44 = vadd.f32 %v1384_v33, %v1356_v52 }
 0x4c5   : > { %v1525_v13 = vmul.f32 3.8918573e-05, %v3215_v5  ;;  %v3230_v14 = vmul.f32 0.70710677, %v3219_v8  ;;  %v3235_v20 = vmul.f32 0.70710677, %v3223_v55 }
 0x4c6   : > { %v1475_v15 = vadd.f32 0.00028619796, %v1474_v10  ;;  %v1486_v16 = vadd.f32 0.001143296, %v1485_v11  ;;  %v1515_v17 = vadd.f32 0.00028619796, %v1514_v12 }
 0x4c7   : > { %v1526_v18 = vadd.f32 0.001143296, %v1525_v13  ;;  %v1552_v19 = vmul.f32 %v3230_v14, %v3230_v14  ;;  %v1592_v26 = vmul.f32 %v3235_v20, %v3235_v20  ;;  %v1839_v52 = vld [vmem:[%s3047_s0 + $0xf8] sm:$0xff] }
 0x4c8   : > { %v1476_v21 = vmul.f32 %v1475_v15, %v3213_v3  ;;  %v1487_v22 = vmul.f32 %v1486_v16, %v3213_v3  ;;  %v1516_v23 = vmul.f32 %v1515_v17, %v3215_v5  ;;  %1899 = vmatpush.msrb.mxu1 %v1839_v52  ;;  %v3268_v16 = vmul.f32 0.70710677, %v3253_v44  ;;  %v1822_v17 = vld [vmem:[%s3047_s0 + $0x70] sm:$0xff] }
 0x4c9   : > { %v1527_v24 = vmul.f32 %v1526_v18, %v3215_v5  ;;  %v3241_v25 = vmin.f32 %v1552_v19, 16.0  ;;  %v3250_v37 = vmin.f32 %v1592_v26, 16.0  ;;  %v1838_v18 = vld [vmem:[%s3047_s0 + $0xf0] sm:$0xff]  ;;  %1877 = vmatpush.msrb.mxu0 %v1822_v17 }
 0x4ca   : > { %v1477_v27 = vadd.f32 0.0036580483, %v1476_v21  ;;  %v1488_v28 = vadd.f32 0.014752088, %v1487_v22  ;;  %v1517_v29 = vadd.f32 0.0036580483, %v1516_v23  ;;  %1900 = vmatpush.msrb.mxu1 %v1838_v18 }
 0x4cb   : > { %v1528_v30 = vadd.f32 0.014752088, %v1527_v24  ;;  %v1554_v31 = vmul.f32 2.1237322e-06, %v3241_v25  ;;  %v1565_v32 = vmul.f32 3.8918573e-05, %v3241_v25 }
 0x4cc   : > { %v1478_v34 = vmul.f32 %v1477_v27, %v3213_v3  ;;  %v1489_v35 = vmul.f32 %v1488_v28, %v3213_v3  ;;  %v1518_v36 = vmul.f32 %v1517_v29, %v3215_v5  ;;  %v1594_v48 = vmul.f32 2.1237322e-06, %v3250_v37  ;;  %v1821_v23 = vld [vmem:[%s3047_s0 + $0x68] sm:$0xff] }
 0x4cd   : > { %v1529_v38 = vmul.f32 %v1528_v30, %v3215_v5  ;;  %v1555_v39 = vadd.f32 0.00028619796, %v1554_v31  ;;  %v1566_v40 = vadd.f32 0.001143296, %v1565_v32  ;;  %v1605_v56 = vmul.f32 3.8918573e-05, %v3250_v37  ;;  %1878 = vmatpush.msrb.mxu0 %v1821_v23 }
 0x4ce   : > { %v1479_v41 = vadd.f32 0.05243302, %v1478_v34  ;;  %v1490_v42 = vadd.f32 0.112945676, %v1489_v35  ;;  %v1519_v43 = vadd.f32 0.05243302, %v1518_v36 }
 0x4cf   : > { %v1530_v45 = vadd.f32 0.112945676, %v1529_v38  ;;  %v1556_v46 = vmul.f32 %v1555_v39, %v3241_v25  ;;  %v1567_v47 = vmul.f32 %v1566_v40, %v3241_v25  ;;  %v1595_v7 = vadd.f32 0.00028619796, %v1594_v48  ;;  %v1837_v24 = vld [vmem:[%s3047_s0 + $0xe8] sm:$0xff]  ;;  %v1820_v32 = vld [vmem:[%s3047_s0 + $0x60] sm:$0xff]  ;;  %v1407_v40 = vpop.f32.mrf.mxu1  ;;  %v1430_v48 = vpop.f32.mrf.mxu2 }
 0x4d0   : > { %v1480_v49 = vmul.f32 %v1479_v41, %v3213_v3  ;;  %v1491_v50 = vmul.f32 %v1490_v42, %v3213_v3  ;;  %v1520_v51 = vmul.f32 %v1519_v43, %v3215_v5  ;;  %v1606_v22 = vadd.f32 0.001143296, %v1605_v56  ;;  %1901 = vmatpush.msrb.mxu1 %v1837_v24  ;;  %v1836_v35 = vld [vmem:[%s3047_s0 + $0xe0] sm:$0xff]  ;;  %v1871_v36 = vld [vmem:[%s3047_s0 + $0x1f8] sm:$0xff]  ;;  %1879 = vmatpush.msrb.mxu0 %v1820_v32  ;;  %v1854_v43 = vld [vmem:[%s3047_s0 + $0x170] sm:$0xff] }
 0x4d1   : > { %v1531_v1 = vmul.f32 %v1530_v45, %v3215_v5  ;;  %v1557_v2 = vadd.f32 0.0036580483, %v1556_v46  ;;  %v1568_v6 = vadd.f32 0.014752088, %v1567_v47  ;;  %v1596_v15 = vmul.f32 %v1595_v7, %v3250_v37  ;;  %v1819_v41 = vld [vmem:[%s3047_s0 + $0x58] sm:$0xff]  ;;  %1945 = vmatpush.msrb.mxu3 %v1871_v36  ;;  %v1834_v7 = vld [vmem:[%s3047_s0 + $0xd0] sm:$0xff] }
 0x4d2   : > { %v1481_v10 = vadd.f32 0.18741608, %v1480_v49  ;;  %v1492_v11 = vadd.f32 0.4994258, %v1491_v50  ;;  %v1521_v21 = vadd.f32 0.18741608, %v1520_v51  ;;  %v1607_v39 = vmul.f32 %v1606_v22, %v3250_v37  ;;  %1902 = vmatpush.msrb.mxu1 %v1836_v35  ;;  %v1453_v49 = vpop.f32.mrf.mxu3  ;;  %1880 = vmatpush.msrb.mxu0 %v1819_v41 }
 0x4d3   : > { %v1532_v12 = vadd.f32 0.4994258, %v1531_v1  ;;  %v1569_v13 = vmul.f32 %v1568_v6, %v3241_v25  ;;  %v1558_v28 = vmul.f32 %v1557_v2, %v3241_v25  ;;  %v1597_v31 = vadd.f32 0.0036580483, %v1596_v15  ;;  %v1835_v42 = vld [vmem:[%s3047_s0 + $0xd8] sm:$0xff]  ;;  %v1818_v6 = vld [vmem:[%s3047_s0 + $0x50] sm:$0xff] }
 0x4d4   : > { %v1493_v19 = vmul.f32 %v1492_v11, %v3213_v3  ;;  %v1482_v26 = vmul.f32 %v1481_v10, %v3213_v3  ;;  %v1855_v3 = vld [vmem:[%s3047_s0 + $0x178] sm:$0xff]  ;;  %v1522_v38 = vmul.f32 %v1521_v21, %v3215_v5  ;;  %v1632_v47 = vmul.f32 %v3268_v16, %v3268_v16  ;;  %1903 = vmatpush.msrb.mxu1 %v1835_v42  ;;  %v1817_v18 = vld [vmem:[%s3047_s0 + $0x48] sm:$0xff]  ;;  %v1832_v35 = vld [vmem:[%s3047_s0 + $0xc0] sm:$0xff] }
 0x4d5   : > { %v1533_v27 = vmul.f32 %v1532_v12, %v3215_v5  ;;  %v1570_v29 = vadd.f32 0.112945676, %v1569_v13  ;;  %v1559_v46 = vadd.f32 0.05243302, %v1558_v28  ;;  %1922 = vmatpush.msrb.mxu2 %v1855_v3  ;;  %v1870_v5 = vld [vmem:[%s3047_s0 + $0x1f0] sm:$0xff]  ;;  %v1598_v50 = vmul.f32 %v1597_v31, %v3250_v37  ;;  %1881 = vmatpush.msrb.mxu0 %v1818_v6  ;;  %v1869_v13 = vld [vmem:[%s3047_s0 + $0x1e8] sm:$0xff] }
 0x4d6   : > { %v3278_v30 = vadd.f32 1.0, %v1493_v19  ;;  %v1483_v45 = vadd.f32 1.1283791, %v1482_v26  ;;  %v3300_v56 = vadd.f32 %v1407_v40, %v1357_v53  ;;  %1946 = vmatpush.msrb.mxu3 %v1870_v5  ;;  %v1523_v57 = vadd.f32 1.1283791, %v1522_v38  ;;  %1904 = vmatpush.msrb.mxu1 %v1834_v7  ;;  %v1833_v24 = vld [vmem:[%s3047_s0 + $0xc8] sm:$0xff] }
 0x4d7   : > { %v3281_v33 = vadd.f32 1.0, %v1533_v27  ;;  %v1571_v34 = vmul.f32 %v1570_v29, %v3241_v25  ;;  %1923 = vmatpush.msrb.mxu2 %v1854_v43  ;;  %v1608_v52 = vadd.f32 0.014752088, %v1607_v39  ;;  %v3304_v1 = vadd.f32 %v1430_v48, %v1358_v61  ;;  %v1853_v61 = vld [vmem:[%s3047_s0 + $0x168] sm:$0xff]  ;;  %1882 = vmatpush.msrb.mxu0 %v1817_v18  ;;  %v1852_v26 = vld [vmem:[%s3047_s0 + $0x160] sm:$0xff]  ;;  %v1867_v38 = vld [vmem:[%s3047_s0 + $0x1d8] sm:$0xff] }
 0x4d8   : > { %2454 = vrcp.f32 %v3278_v30  ;;  %v3308_v2 = vadd.f32 %v1453_v49, %v1359_v0  ;;  %v3313_v10 = vmul.f32 %v1483_v45, %v3202_v9  ;;  %v1560_v53 = vmul.f32 %v1559_v46, %v3241_v25  ;;  %1947 = vmatpush.msrb.mxu3 %v1869_v13  ;;  %v1868_v27 = vld [vmem:[%s3047_s0 + $0x1e0] sm:$0xff]  ;;  %1905 = vmatpush.msrb.mxu1 %v1833_v24  ;;  %v1815_v42 = vld [vmem:[%s3047_s0 + $0x38] sm:$0xff]  ;;  %v1850_v45 = vld [vmem:[%s3047_s0 + $0x150] sm:$0xff] }
 0x4d9   : > { %2456 = vrcp.f32 %v3281_v33  ;;  %v1572_v51 = vadd.f32 0.4994258, %v1571_v34  ;;  %v3317_v12 = vmin.f32 %v1632_v47, 16.0  ;;  %v1504_v0 = vand.u32 2147483647, %v3278_v30  ;;  %1924 = vmatpush.msrb.mxu2 %v1853_v61  ;;  %v1816_v34 = vld [vmem:[%s3047_s0 + $0x40] sm:$0xff] }
 0x4da   : > { %v1506_v9 = vand.u32 2147483648, %v3278_v30  ;;  %v1599_v15 = vadd.f32 0.05243302, %v1598_v50  ;;  %v1609_v17 = vmul.f32 %v1608_v52, %v3250_v37  ;;  %vm1500_vm12 = vweird.f32 %v3278_v30  ;;  %1948 = vmatpush.msrb.mxu3 %v1868_v27  ;;  %1883 = vmatpush.msrb.mxu0 %v1816_v34  ;;  %v1831_v43 = vld [vmem:[%s3047_s0 + $0xb8] sm:$0xff]  ;;  %v1866_v5 = vld [vmem:[%s3047_s0 + $0x1d0] sm:$0xff]  ;;  %v1829_v18 = vld [vmem:[%s3047_s0 + $0xa8] sm:$0xff] }
 0x4db   : > { %v1573_v11 = vmul.f32 %v1572_v51, %v3241_v25  ;;  %v3335_v23 = vmul.f32 0.70710677, %v3300_v56  ;;  %v3341_v28 = vmul.f32 %v1523_v57, %v3205_v60  ;;  %v1544_v31 = vand.u32 2147483647, %v3281_v33  ;;  %1925 = vmatpush.msrb.mxu2 %v1852_v26  ;;  %v1851_v60 = vld [vmem:[%s3047_s0 + $0x158] sm:$0xff]  ;;  %1906 = vmatpush.msrb.mxu1 %v1832_v35  ;;  %v1814_v50 = vld [vmem:[%s3047_s0 + $0x30] sm:$0xff] }
 0x4dc   : > { %v1610_v32 = vadd.f32 0.112945676, %v1609_v17  ;;  %v1546_v36 = vand.u32 2147483648, %v3281_v33  ;;  %vm1540_vm14 = vweird.f32 %v3281_v33  ;;  %v3356_v41 = vmul.f32 0.70710677, %v3304_v1  ;;  %1949 = vmatpush.msrb.mxu3 %v1867_v38  ;;  %1884 = vmatpush.msrb.mxu0 %v1815_v42  ;;  %v1830_v51 = vld [vmem:[%s3047_s0 + $0xb0] sm:$0xff] }
 0x4dd   : > { %v3332_v22 = vadd.f32 1.0, %v1573_v11  ;;  %1926 = vmatpush.msrb.mxu2 %v1851_v60  ;;  %v1561_v47 = vadd.f32 0.18741608, %v1560_v53  ;;  %v1600_v48 = vmul.f32 %v1599_v15, %v3250_v37  ;;  %v1672_v49 = vmul.f32 %v3335_v23, %v3335_v23  ;;  %1907 = vmatpush.msrb.mxu1 %v1831_v43  ;;  %v1849_v53 = vld [vmem:[%s3047_s0 + $0x148] sm:$0xff]  ;;  %v1864_v27 = vld [vmem:[%s3047_s0 + $0x1c0] sm:$0xff]  ;;  %v1811_v42 = vld [vmem:[%s3047_s0 + $0x18] sm:$0xff] }
 0x4de   : > { %v3321_v54 = vpop.eup %2454  ;;  %v1611_v40 = vmul.f32 %v1610_v32, %v3250_v37  ;;  %v1634_v7 = vmul.f32 2.1237322e-06, %v3317_v12  ;;  %vm3381_vm1 = vcmp.eq.f32.partialorder %v1504_v0, 8.507059e+37  ;;  %v1507_v61 = vor.u32 1.1754944e-38, %v1506_v9  ;;  %1950 = vmatpush.msrb.mxu3 %v1866_v5  ;;  %1885 = vmatpush.msrb.mxu0 %v1814_v50  ;;  %v1865_v15 = vld [vmem:[%s3047_s0 + $0x1c8] sm:$0xff]  ;;  %v1848_v9 = vld [vmem:[%s3047_s0 + $0x140] sm:$0xff] }
 0x4df   : > { %v3327_v19 = vpop.eup %2456  ;;  %v1496_v21 = vmul.f32 %v3321_v54, %v3278_v30  ;;  %vm1501_vm13 = vweird.f32 %v3321_v54  ;;  %2458 = vrcp.f32 %v3332_v22  ;;  %1927 = vmatpush.msrb.mxu2 %v1850_v45  ;;  %vm3385_vm2 = vcmp.eq.f32.partialorder %v1544_v31, 8.507059e+37  ;;  %v1813_v17 = vld [vmem:[%s3047_s0 + $0x28] sm:$0xff]  ;;  %1908 = vmatpush.msrb.mxu1 %v1830_v51  ;;  %v1828_v38 = vld [vmem:[%s3047_s0 + $0xa0] sm:$0xff]  ;;  %v1862_v51 = vld [vmem:[%s3047_s0 + $0x1b0] sm:$0xff] }
 0x4e0   : > { %v1536_v29 = vmul.f32 %v3327_v19, %v3281_v33  ;;  %vm3372_vm15 = vmor %vm1500_vm12, %vm1501_vm13  ;;  %vm1541_vm0 = vweird.f32 %v3327_v19  ;;  %v1612_v6 = vadd.f32 0.4994258, %v1611_v40  ;;  %v3394_v0 = vmin.f32 %v1672_v49, 16.0  ;;  %1951 = vmatpush.msrb.mxu3 %v1865_v15  ;;  %1886 = vmatpush.msrb.mxu0 %v1813_v17  ;;  %v1809_v13 = vld [vmem:[%s3047_s0 + $0x8] sm:$0xff] }
 0x4e1   : > { %v1497_v3 = vsub.f32 1.0, %v1496_v21  ;;  %v1712_v26 = vmul.f32 %v3356_v41, %v3356_v41  ;;  %1928 = vmatpush.msrb.mxu2 %v1849_v53  ;;  %vm3410_vm3 = vmor %vm1540_vm14, %vm1541_vm0  ;;  %v1547_v35 = vor.u32 1.1754944e-38, %v1546_v36  ;;  %v1601_v60 = vadd.f32 0.18741608, %v1600_v48  ;;  %1909 = vmatpush.msrb.mxu1 %v1829_v18  ;;  %v1863_v36 = vld [vmem:[%s3047_s0 + $0x1b8] sm:$0xff]  ;;  %v1846_v48 = vld [vmem:[%s3047_s0 + $0x130] sm:$0xff] }
 0x4e2   : > { %v1537_v39 = vsub.f32 1.0, %v1536_v29  ;;  %v1613_v24 = vmul.f32 %v1612_v6, %v3250_v37  ;;  %v1812_v29 = vld [vmem:[%s3047_s0 + $0x20] sm:$0xff]  ;;  %v1635_v40 = vadd.f32 0.00028619796, %v1634_v7  ;;  %1952 = vmatpush.msrb.mxu3 %v1864_v27  ;;  %v1456_v49 = vmul.f32 0.5, %v3195_v58  ;;  %v1810_v58 = vld [vmem:[%s3047_s0 + $0x10] sm:$0xff] }
 0x4e3   : > { %v1498_v46 = vmul.f32 %v3321_v54, %v1497_v3  ;;  %v1562_v3 = vmul.f32 %v1561_v47, %v3241_v25  ;;  %1929 = vmatpush.msrb.mxu2 %v1848_v9  ;;  %v1847_v25 = vld [vmem:[%s3047_s0 + $0x138] sm:$0xff]  ;;  %v3432_v47 = vmul.f32 0.70710677, %v3308_v2  ;;  %1887 = vmatpush.msrb.mxu0 %v1812_v29  ;;  %v3438_v50 = vmin.f32 %v1712_v26, 16.0  ;;  %v1826_v7 = vld [vmem:[%s3047_s0 + $0x90] sm:$0xff]  ;;  %v1845_v53 = vld [vmem:[%s3047_s0 + $0x128] sm:$0xff] }
 0x4e4   : > { %v1538_v52 = vmul.f32 %v3327_v19, %v1537_v39  ;;  %1910 = vmatpush.msrb.mxu1 %v1828_v38  ;;  %v1586_v6 = vand.u32 2147483648, %v3332_v22  ;;  %1953 = vmatpush.msrb.mxu3 %v1863_v36  ;;  %v1584_v30 = vand.u32 2147483647, %v3332_v22  ;;  %v1457_v15 = vmul.f32 0.5, %v3199_v59  ;;  %v1825_v18 = vld [vmem:[%s3047_s0 + $0x88] sm:$0xff]  ;;  %v1860_v59 = vld [vmem:[%s3047_s0 + $0x1a0] sm:$0xff] }
 0x4e5   : > { %v1499_v11 = vadd.f32 %v3321_v54, %v1498_v46  ;;  %v3401_v31 = vpop.eup %2458  ;;  %v3429_v46 = vadd.f32 1.0, %v1613_v24  ;;  %1930 = vmatpush.msrb.mxu2 %v1847_v25  ;;  %1888 = vmatpush.msrb.mxu0 %v1811_v42  ;;  %vm1580_vm5 = vweird.f32 %v3332_v22  ;;  %v1752_v17 = vmul.f32 %v3432_v47, %v3432_v47  ;;  %v1808_v29 = vld [vmem:[%s3047_s0] sm:$0xff] }
 0x4e6   : > { %v1539_v21 = vadd.f32 %v3327_v19, %v1538_v52  ;;  %v1576_v39 = vmul.f32 %v3401_v31, %v3332_v22  ;;  %v1563_v52 = vadd.f32 1.1283791, %v1562_v3  ;;  %vm1581_vm4 = vweird.f32 %v3401_v31  ;;  %1954 = vmatpush.msrb.mxu3 %v1862_v51  ;;  %v1824_v3 = vld [vmem:[%s3047_s0 + $0x80] sm:$0xff] }
 0x4e7   : > { %v1503_v32 = vsel %vm3372_vm15, %v3321_v54, %v1499_v11  ;;  %2460 = vrcp.f32 %v3429_v46  ;;  %1931 = vmatpush.msrb.mxu2 %v1846_v48  ;;  %1889 = vmatpush.msrb.mxu0 %v1810_v58  ;;  %v1636_v26 = vmul.f32 %v1635_v40, %v3317_v12  ;;  %v1714_v27 = vmul.f32 2.1237322e-06, %v3438_v50  ;;  %vm3468_vm6 = vmor %vm1580_vm5, %vm1581_vm4  ;;  %v1859_v40 = vld [vmem:[%s3047_s0 + $0x198] sm:$0xff] }
 0x4e8   : > { %v1508_v54 = vsel %vm3381_vm1, %v1507_v61, %v1503_v32  ;;  %v1543_v33 = vsel %vm3410_vm3, %v3327_v19, %v1539_v21  ;;  %v1827_v19 = vld [vmem:[%s3047_s0 + $0x98] sm:$0xff]  ;;  %v1577_v5 = vsub.f32 1.0, %v1576_v39  ;;  %v1861_v61 = vld [vmem:[%s3047_s0 + $0x1a8] sm:$0xff]  ;;  %v1844_v21 = vld [vmem:[%s3047_s0 + $0x120] sm:$0xff]  ;;  %v1587_v34 = vor.u32 1.1754944e-38, %v1586_v6 }
 0x4e9   : > { %v1509_v43 = vmul.f32 %v1508_v54, %v3313_v10  ;;  %v1548_v45 = vsel %vm3385_vm2, %v1547_v35, %v1543_v33  ;;  %v1674_v10 = vmul.f32 2.1237322e-06, %v3394_v0  ;;  %1911 = vmatpush.msrb.mxu1 %v1827_v19  ;;  %1932 = vmatpush.msrb.mxu2 %v1845_v53  ;;  %v3472_v35 = vmin.f32 %v1752_v17, 16.0  ;;  %v1841_v6 = vld [vmem:[%s3047_s0 + $0x108] sm:$0xff] }
 0x4ea   : > { %v1549_v57 = vmul.f32 %v1548_v45, %v3341_v28  ;;  %v1578_v11 = vmul.f32 %v3401_v31, %v1577_v5  ;;  %v1602_v28 = vmul.f32 %v1601_v60, %v3250_v37  ;;  %1955 = vmatpush.msrb.mxu3 %v1861_v61  ;;  %1890 = vmatpush.msrb.mxu0 %v1809_v13  ;;  %v1843_v60 = vld [vmem:[%s3047_s0 + $0x118] sm:$0xff]  ;;  %vm1585_vm7 = vcmp.eq.f32.partialorder %v1584_v30, 8.507059e+37  ;;  %v1842_v45 = vld [vmem:[%s3047_s0 + $0x110] sm:$0xff]  ;;  %v1840_v61 = vld [vmem:[%s3047_s0 + $0x100] sm:$0xff] }
 0x4eb   : > { %v2273_v37 = vclamps-f32 %v1509_v43, 1.0  ;;  %v1675_v9 = vadd.f32 0.00028619796, %v1674_v10  ;;  %1912 = vmatpush.msrb.mxu1 %v1826_v7  ;;  %v1564_v33 = vmul.f32 %v1563_v52, %v3230_v14  ;;  %1933 = vmatpush.msrb.mxu2 %v1844_v21  ;;  %v1754_v42 = vmul.f32 2.1237322e-06, %v3472_v35  ;;  %v1858_v10 = vld [vmem:[%s3047_s0 + $0x190] sm:$0xff] }
 0x4ec   : > { %v1579_v24 = vadd.f32 %v3401_v31, %v1578_v11  ;;  %v2274_v54 = vclamps-f32 %v1549_v57, 1.0  ;;  %v1603_v39 = vadd.f32 1.1283791, %v1602_v28  ;;  %1956 = vmatpush.msrb.mxu3 %v1860_v59  ;;  %1891 = vmatpush.msrb.mxu0 %v1808_v29  ;;  %v1458_v19 = vmul.f32 0.5, %v3219_v8  ;;  %v1857_v7 = vld [vmem:[%s3047_s0 + $0x188] sm:$0xff] }
 0x4ed   : > { %v1792_v38 = vadd.f32 1.0, %v2273_v37  ;;  %1913 = vmatpush.msrb.mxu1 %v1825_v18  ;;  %v3481_v25 = vpop.eup %2460  ;;  %v1637_v5 = vadd.f32 0.0036580483, %v1636_v26  ;;  %1934 = vmatpush.msrb.mxu2 %v1843_v60  ;;  %v1676_v51 = vmul.f32 %v1675_v9, %v3394_v0  ;;  %v1715_v57 = vadd.f32 0.00028619796, %v1714_v27 }
 0x4ee   : > { %v1583_v22 = vsel %vm3468_vm6, %v3401_v31, %v1579_v24  ;;  %v1793_v14 = vadd.f32 1.0, %v2274_v54  ;;  %v1616_v48 = vmul.f32 %v3481_v25, %v3429_v46  ;;  %v1755_v52 = vadd.f32 0.00028619796, %v1754_v42  ;;  %1957 = vmatpush.msrb.mxu3 %v1859_v40 }
 0x4ef   : > { %v1588_v36 = vsel %vm1585_vm7, %v1587_v34, %v1583_v22  ;;  %v1800_v43 = vmul.f32 %v1792_v38, %v1456_v49  ;;  %1914 = vmatpush.msrb.mxu1 %v1824_v3  ;;  %v1604_v8 = vmul.f32 %v1603_v39, %v3235_v20  ;;  %1935 = vmatpush.msrb.mxu2 %v1842_v45  ;;  %v1645_v11 = vmul.f32 3.8918573e-05, %v3317_v12 }
 0x4f0   : > { %v1589_v31 = vmul.f32 %v1588_v36, %v1564_v33  ;;  %v1801_v49 = vmul.f32 %v1793_v14, %v1457_v15  ;;  %v1617_v58 = vsub.f32 1.0, %v1616_v48  ;;  %vm1620_vm8 = vweird.f32 %v3429_v46  ;;  %1958 = vmatpush.msrb.mxu3 %v1858_v10  ;;  %v1856_v15 = vld [vmem:[%s3047_s0 + $0x180] sm:$0xff] }
 0x4f1   : > { %1892 = vmatmul.f32.vlgmr.msrb.gmra.mxu0 %v1800_v43  ;;  %v1624_v30 = vand.u32 2147483647, %v3429_v46  ;;  %v1626_v28 = vand.u32 2147483648, %v3429_v46  ;;  %v1685_v13 = vmul.f32 3.8918573e-05, %v3394_v0  ;;  %vm1621_vm9 = vweird.f32 %v3481_v25  ;;  %1936 = vmatpush.msrb.mxu2 %v1841_v6 }
 0x4f2   : > { %v2275_v53 = vclamps-f32 %v1589_v31, 1.0  ;;  %1915 = vmatmul.f32.vlgmr.msrb.gmra.mxu1 %v1801_v49  ;;  %v1618_v20 = vmul.f32 %v3481_v25, %v1617_v58  ;;  %v1646_v18 = vadd.f32 0.001143296, %v1645_v11  ;;  %v1677_v21 = vadd.f32 0.0036580483, %v1676_v51  ;;  %1959 = vmatpush.msrb.mxu3 %v1857_v7  ;;  %vm1622_vm10 = vmor %vm1620_vm8, %vm1621_vm9 }
 0x4f3   : > { %v1716_v37 = vmul.f32 %v1715_v57, %v3438_v50  ;;  %v1756_v24 = vmul.f32 %v1755_v52, %v3472_v35  ;;  %v1686_v26 = vadd.f32 0.001143296, %v1685_v13  ;;  %1937 = vmatpush.msrb.mxu2 %v1840_v61  ;;  %v1725_v29 = vmul.f32 3.8918573e-05, %v3438_v50 }
 0x4f4   : > { %v1794_v17 = vadd.f32 1.0, %v2275_v53  ;;  %v1619_v9 = vadd.f32 %v3481_v25, %v1618_v20  ;;  %v1647_v59 = vmul.f32 %v1646_v18, %v3317_v12  ;;  %vm1625_vm11 = vcmp.eq.f32.partialorder %v1624_v30, 8.507059e+37  ;;  %1960 = vmatpush.msrb.mxu3 %v1856_v15 }
 0x4f5   : > { %v1627_v32 = vor.u32 1.1754944e-38, %v1626_v28  ;;  %v1638_v34 = vmul.f32 %v1637_v5, %v3317_v12  ;;  %v1687_v3 = vmul.f32 %v1686_v26, %v3394_v0  ;;  %v1726_v54 = vadd.f32 0.001143296, %v1725_v29 }
 0x4f6   : > { %v1802_v27 = vmul.f32 %v1794_v17, %v1458_v19  ;;  %v1623_v60 = vsel %vm1622_vm10, %v3481_v25, %v1619_v9  ;;  %v1648_v38 = vadd.f32 0.014752088, %v1647_v59  ;;  %v1765_v33 = vmul.f32 3.8918573e-05, %v3472_v35 }
 0x4f7   : > { %v1628_v22 = vsel %vm1625_vm11, %v1627_v32, %v1623_v60  ;;  %v1678_v39 = vmul.f32 %v1677_v21, %v3394_v0  ;;  %v1717_v40 = vadd.f32 0.0036580483, %v1716_v37  ;;  %v1757_v46 = vadd.f32 0.0036580483, %v1756_v24 }
 0x4f8   : > { %1938 = vmatmul.f32.vlgmr.msrb.gmra.mxu2 %v1802_v27  ;;  %v1629_v36 = vmul.f32 %v1628_v22, %v1604_v8  ;;  %v1649_v42 = vmul.f32 %v1648_v38, %v3317_v12  ;;  %v1688_v43 = vadd.f32 0.014752088, %v1687_v3  ;;  %v1727_v14 = vmul.f32 %v1726_v54, %v3438_v50 }
 0x4f9   : > { %v1459_v45 = vmul.f32 0.5, %v3223_v55  ;;  %v1639_v19 = vadd.f32 0.05243302, %v1638_v34  ;;  %v1766_v25 = vadd.f32 0.001143296, %v1765_v33  ;;  %v1718_v57 = vmul.f32 %v1717_v40, %v3438_v50 }
 0x4fa   : > { %v2276_v31 = vclamps-f32 %v1629_v36, 1.0  ;;  %v1650_v48 = vadd.f32 0.112945676, %v1649_v42  ;;  %v1689_v5 = vmul.f32 %v1688_v43, %v3394_v0  ;;  %v1728_v10 = vadd.f32 0.014752088, %v1727_v14 }
 0x4fb   : > { %v1679_v51 = vadd.f32 0.05243302, %v1678_v39  ;;  %v1758_v52 = vmul.f32 %v1757_v46, %v3472_v35  ;;  %v1767_v49 = vmul.f32 %v1766_v25, %v3472_v35  ;;  %v1640_v7 = vmul.f32 %v1639_v19, %v3317_v12 }
 0x4fc   : > { %v1795_v6 = vadd.f32 1.0, %v2276_v31  ;;  %v1651_v8 = vmul.f32 %v1650_v48, %v3317_v12  ;;  %v1690_v58 = vadd.f32 0.112945676, %v1689_v5  ;;  %v1729_v55 = vmul.f32 %v1728_v10, %v3438_v50 }
 0x4fd   : > { %v1768_v53 = vadd.f32 0.014752088, %v1767_v49  ;;  %v1680_v13 = vmul.f32 %v1679_v51, %v3394_v0  ;;  %v1719_v20 = vadd.f32 0.05243302, %v1718_v57  ;;  %v1759_v17 = vadd.f32 0.05243302, %v1758_v52 }
 0x4fe   : > { %v1803_v11 = vmul.f32 %v1795_v6, %v1459_v45  ;;  %v1652_v30 = vadd.f32 0.4994258, %v1651_v8  ;;  %v1691_v28 = vmul.f32 %v1690_v58, %v3394_v0  ;;  %v1730_v61 = vadd.f32 0.112945676, %v1729_v55 }
 0x4ff   : > { %v1769_v15 = vmul.f32 %v1768_v53, %v3472_v35  ;;  %v1641_v26 = vadd.f32 0.18741608, %v1640_v7  ;;  %v1681_v29 = vadd.f32 0.18741608, %v1680_v13  ;;  %v1720_v34 = vmul.f32 %v1719_v20, %v3438_v50 }
 0x500   : > { %1961 = vmatmul.f32.vlgmr.msrb.gmra.mxu3 %v1803_v11  ;;  %v1653_v18 = vmul.f32 %v1652_v30, %v3317_v12  ;;  %v1692_v21 = vadd.f32 0.4994258, %v1691_v28  ;;  %v1731_v37 = vmul.f32 %v1730_v61, %v3438_v50  ;;  %v1760_v3 = vmul.f32 %v1759_v17, %v3472_v35 }
 0x501   : > { %v1770_v24 = vadd.f32 0.112945676, %v1769_v15  ;;  %v1642_v33 = vmul.f32 %v1641_v26, %v3317_v12  ;;  %v1682_v22 = vmul.f32 %v1681_v29, %v3394_v0  ;;  %v1721_v39 = vadd.f32 0.18741608, %v1720_v34 }
 0x502   : > { %v1654_v9 = vadd.f32 1.0, %v1653_v18  ;;  %v1693_v27 = vmul.f32 %v1692_v21, %v3394_v0  ;;  %v1732_v59 = vadd.f32 0.4994258, %v1731_v37  ;;  %v1761_v40 = vadd.f32 0.18741608, %v1760_v3 }
 0x503   : > { %v1771_v32 = vmul.f32 %v1770_v24, %v3472_v35  ;;  %v1643_v43 = vadd.f32 1.1283791, %v1642_v33  ;;  %v1683_v14 = vadd.f32 1.1283791, %v1682_v22  ;;  %v1722_v25 = vmul.f32 %v1721_v39, %v3438_v50 }
 0x504   : > { %2462 = vrcp.f32 %v1654_v9  ;;  %v1694_v60 = vadd.f32 1.0, %v1693_v27  ;;  %v1733_v38 = vmul.f32 %v1732_v59, %v3438_v50  ;;  %v1762_v12 = vmul.f32 %v1761_v40, %v3472_v35 }
 0x505   : > { %v1772_v54 = vadd.f32 0.4994258, %v1771_v32  ;;  %v1664_v48 = vand.u32 2147483647, %v1654_v9  ;;  %v1460_v5 = vmul.f32 0.5, %v3253_v44  ;;  %v1644_v10 = vmul.f32 %v1643_v43, %v3268_v16 }
 0x506   : > { %2464 = vrcp.f32 %v1694_v60  ;;  %v3538_v46 = vadd.f32 1.0, %v1733_v38  ;;  %v1666_v51 = vand.u32 2147483648, %v1654_v9  ;;  %v1684_v52 = vmul.f32 %v1683_v14, %v3335_v23 }
 0x507   : > { %v1773_v36 = vmul.f32 %v1772_v54, %v3472_v35  ;;  %v1704_v6 = vand.u32 2147483647, %v1694_v60  ;;  %v1723_v50 = vadd.f32 1.1283791, %v1722_v25  ;;  %v1763_v58 = vadd.f32 1.1283791, %v1762_v12 }
 0x508   : > { %2466 = vrcp.f32 %v3538_v46  ;;  %v1706_v55 = vand.u32 2147483648, %v1694_v60  ;;  %vm1660_vm13 = vweird.f32 %v1654_v9  ;;  %vm1665_vm14 = vcmp.eq.f32.partialorder %v1664_v48, 8.507059e+37 }
 0x509   : > { %v3542_v19 = vadd.f32 1.0, %v1773_v36  ;;  %v1667_v44 = vor.u32 1.1754944e-38, %v1666_v51  ;;  %v1746_v11 = vand.u32 2147483648, %v3538_v46  ;;  %vm1700_vm1 = vweird.f32 %v1694_v60 }
 0x50a   : > { %v2463_v42 = vpop.eup %2462  ;;  %vm3552_vm2 = vcmp.eq.f32.partialorder %v1704_v6, 8.507059e+37  ;;  %v1707_v15 = vor.u32 1.1754944e-38, %v1706_v55  ;;  %v1744_v37 = vand.u32 2147483647, %v3538_v46  ;;  %vm1740_vm5 = vweird.f32 %v3538_v46 }
 0x50b   : > { %v1656_v45 = vmul.f32 %v2463_v42, %v1654_v9  ;;  %2468 = vrcp.f32 %v3542_v19  ;;  %vm1661_vm12 = vweird.f32 %v2463_v42  ;;  %v1747_v26 = vor.u32 1.1754944e-38, %v1746_v11 }
 0x50c   : > { %v2465_v0 = vpop.eup %2464  ;;  %vm1662_vm15 = vmor %vm1660_vm13, %vm1661_vm12  ;;  %v1786_v32 = vand.u32 2147483648, %v3542_v19  ;;  %v1724_v38 = vmul.f32 %v1723_v50, %v3356_v41  ;;  %vm1745_vm8 = vcmp.eq.f32.partialorder %v1744_v37, 8.507059e+37  ;;  %vm1780_vm9 = vweird.f32 %v3542_v19 }
 0x50d   : > { %v1657_v31 = vsub.f32 1.0, %v1656_v45  ;;  %v1696_v57 = vmul.f32 %v2465_v0, %v1694_v60  ;;  %vm1701_vm0 = vweird.f32 %v2465_v0  ;;  %v1784_v60 = vand.u32 2147483647, %v3542_v19 }
 0x50e   : > { %v2467_v8 = vpop.eup %2466  ;;  %vm1702_vm3 = vmor %vm1700_vm1, %vm1701_vm0  ;;  %v1787_v43 = vor.u32 1.1754944e-38, %v1786_v32  ;;  %v1764_v14 = vmul.f32 %v1763_v58, %v3432_v47  ;;  %v1462_v48 = vmul.f32 0.5, %v3304_v1 }
 0x50f   : > { %v1658_v49 = vmul.f32 %v2463_v42, %v1657_v31  ;;  %v1697_v35 = vsub.f32 1.0, %v1696_v57  ;;  %v1736_v53 = vmul.f32 %v2467_v8, %v3538_v46  ;;  %vm1741_vm4 = vweird.f32 %v2467_v8  ;;  %v2433_v57 = vld [vmem:[%s759_s10] ss:$0 sm:$0xff] }
 0x510   : > { %vm1742_vm6 = vmor %vm1740_vm5, %vm1741_vm4  ;;  %v1461_v46 = vmul.f32 0.5, %v3300_v56  ;;  %vm1785_vm11 = vcmp.eq.f32.partialorder %v1784_v60, 8.507059e+37 }
 0x511   : > { %v1659_v7 = vadd.f32 %v2463_v42, %v1658_v49  ;;  %v1698_v16 = vmul.f32 %v2465_v0, %v1697_v35  ;;  %v2469_v23 = vpop.eup %2468  ;;  %v1737_v61 = vsub.f32 1.0, %v1736_v53 }
 0x512   : > { %v1776_v17 = vmul.f32 %v2469_v23, %v3542_v19  ;;  %vm1781_vm7 = vweird.f32 %v2469_v23 }
 0x513   : > { %v1663_v30 = vsel %vm1662_vm15, %v2463_v42, %v1659_v7  ;;  %v1699_v20 = vadd.f32 %v2465_v0, %v1698_v16  ;;  %v1738_v21 = vmul.f32 %v2467_v8, %v1737_v61  ;;  %vm1782_vm10 = vmor %vm1780_vm9, %vm1781_vm7 }
 0x514   : > { %v1668_v13 = vsel %vm1665_vm14, %v1667_v44, %v1663_v30  ;;  %v1777_v9 = vsub.f32 1.0, %v1776_v17 }
 0x515   : > { %v1669_v18 = vmul.f32 %v1668_v13, %v1644_v10  ;;  %v1703_v24 = vsel %vm1702_vm3, %v2465_v0, %v1699_v20  ;;  %v1739_v29 = vadd.f32 %v2467_v8, %v1738_v21  ;;  %v1463_v10 = vmul.f32 0.5, %v3308_v2 }
 0x516   : > { %v1708_v59 = vsel %vm3552_vm2, %v1707_v15, %v1703_v24  ;;  %v1778_v3 = vmul.f32 %v2469_v23, %v1777_v9 }
 0x517   : > { %v2277_v27 = vclamps-f32 %v1669_v18, 1.0  ;;  %v1709_v34 = vmul.f32 %v1708_v59, %v1684_v52  ;;  %v1743_v33 = vsel %vm1742_vm6, %v2467_v8, %v1739_v29 }
 0x518   : > { %v1748_v39 = vsel %vm1745_vm8, %v1747_v26, %v1743_v33  ;;  %v1779_v40 = vadd.f32 %v2469_v23, %v1778_v3 }
 0x519   : > { %v1796_v54 = vadd.f32 1.0, %v2277_v27  ;;  %v2278_v22 = vclamps-f32 %v1709_v34, 1.0  ;;  %v1749_v42 = vmul.f32 %v1748_v39, %v1724_v38 }
 0x51a   : > { %v1783_v25 = vsel %vm1782_vm10, %v2469_v23, %v1779_v40 }
 0x51b   : > { %v1804_v36 = vmul.f32 %v1796_v54, %v1460_v5  ;;  %v1797_v45 = vadd.f32 1.0, %v2278_v22  ;;  %v2279_v41 = vclamps-f32 %v1749_v42, 1.0  ;;  %v1788_v12 = vsel %vm1785_vm11, %v1787_v43, %v1783_v25 }
 0x51c   : > { %v1789_v31 = vmul.f32 %v1788_v12, %v1764_v14 }
 0x51d   : > { %1895 = vmatmul.f32.gmra.mxu0 %v1804_v36  ;;  %v1805_v0 = vmul.f32 %v1797_v45, %v1461_v46  ;;  %v1798_v19 = vadd.f32 1.0, %v2279_v41 }
 0x51e   : > { %v2280_v56 = vclamps-f32 %v1789_v31, 1.0 }
 0x51f   : > { %1918 = vmatmul.f32.gmra.mxu1 %v1805_v0  ;;  %v1806_v5 = vmul.f32 %v1798_v19, %v1462_v48 }
 0x520   : > { %v1799_v51 = vadd.f32 1.0, %v2280_v56 }
 0x521   : > { %1941 = vmatmul.f32.gmra.mxu2 %v1806_v5 }
 0x522   : > { %v1807_v47 = vmul.f32 %v1799_v51, %v1463_v10 }
 0x524   : > { %1964 = vmatmul.f32.gmra.mxu3 %v1807_v47 }
 0x56e   : > { %v1893_v52 = vpop.f32.mrf.mxu0 }
 0x56f   : > { %v1894_v49 = vadd.f32 %v2433_v57, %v1893_v52  ;;  %v1916_v6 = vpop.f32.mrf.mxu1 }
 0x571   : > { %v1917_v8 = vadd.f32 %v1916_v6, %v1894_v49 }
 0x57b   : > { %v1939_v1 = vpop.f32.mrf.mxu2 }
 0x57c   : > { %v1940_v50 = vadd.f32 %v1939_v1, %v1917_v8 }
 0x583   : > { %v1962_v58 = vpop.f32.mrf.mxu3 }
 0x584   : > { %v1963_v35 = vadd.f32 %v1962_v58, %v1940_v50 }
 0x586   : > { %v1968_v55 = vadd.f32 %v1963_v35, %v3095_v63 }
 0x59a   : > { %v1896_v2 = vpop.f32.mrf.mxu0 }
 0x59b   : > { %v1897_v7 = vadd.f32 %v2433_v57, %v1896_v2 }
 0x59c   : > { %v1919_v53 = vpop.f32.mrf.mxu1 }
 0x59d   : > { %v1920_v44 = vadd.f32 %v1919_v53, %v1897_v7 }
 0x5a4   : > { %v1942_v16 = vpop.f32.mrf.mxu2 }
 0x5a5   : > { %v1943_v11 = vadd.f32 %v1942_v16, %v1920_v44 }
 0x5a6   : > { %1973 = sbr.rel (%p2281_p13) target bundleno = 1453 (0x5ad), region = 112 }
 0x5a7   : > { %v1965_v23 = vpop.f32.mrf.mxu3 }
 0x5a8   : > { %v1966_v30 = vadd.f32 %v1965_v23, %v1943_v11 }
 0x5aa   : > { %v1969_v28 = vadd.f32 %v1966_v30, %v3099_v4 }
 0x5ab   : > { %1974 = vst [vmem:[%s3049_s17] sm:$0xff] %v1968_v55 }
 0x5ac   : > { %1975 = vst [vmem:[%s3049_s17 + $0x8] sm:$0xff] %v1969_v28 }
 0x5ad PF: > { %s3753_s10 = sld [smem:[#allocation17_spill]] }
 0x5b3   : > { %p2282_p2 = scmp.ne.s32.totalorder %s3753_s10, 1 }
 0x5b4   : > { %s3754_s21 = sld [smem:[#allocation41_spill]] (!%p2282_p2) }
 0x5b5   : > { %1979 = sbr.rel (%p2282_p2) target bundleno = 1751 (0x6d7), region = 116  ;;  %s3755_s5 = sld [smem:[#allocation42_spill]] (!%p2282_p2) }
 0x5ba   : > { %1982 = vadd.xlane.f32.xlu0 %v1968_v55  ;;  %v2470_v45 = vld [vmem:[%s3754_s21] ss:$0 sm:$0xff] }
 0x5bb   : > { %v2471_v31 = vld [vmem:[%s3755_s5] ss:$0 sm:$0xff] }
 0x5c2   : > { %1984 = vadd.xlane.f32.xlu0 %v1969_v28 }
 0x62d   : > { %v1983_v63 = vpop.xlane.xlu0 %1982 }
 0x62e   : > { %v1986_v61 = vmul.f32 %v1983_v63, %v3078_v62 }
 0x630   : > { %v1988_v13 = vsub.f32 %v1968_v55, %v1986_v61 }
 0x632   : > { %v1990_v20 = vmul.f32 %v1988_v13, %v1988_v13 }
 0x634   : > { %1992 = vadd.xlane.f32.xlu1 %v1990_v20 }
 0x635   : > { %v1985_v4 = vpop.xlane.xlu0 %1984 }
 0x636   : > { %v1987_v15 = vmul.f32 %v1985_v4, %v3078_v62 }
 0x638   : > { %v1989_v17 = vsub.f32 %v1969_v28, %v1987_v15 }
 0x63a   : > { %v1991_v18 = vmul.f32 %v1989_v17, %v1989_v17 }
 0x63c   : > { %1994 = vadd.xlane.f32.xlu1 %v1991_v18 }
 0x6a7   : > { %v1993_v21 = vpop.xlane.xlu1 %1992 }
 0x6a8   : > { %v1996_v37 = vmul.f32 0.007874016, %v1993_v21 }
 0x6aa   : > { %2472 = vrsqrt.f32 %v1996_v37  ;;  %vm2005_vm12 = vcmp.eq.f32.partialorder %v1996_v37, inf  ;;  %v2008_v62 = vand.u32 2147483648, %v1996_v37  ;;  %vm2007_vm13 = vcmp.eq.f32.partialorder %v1996_v37, 0.0 }
 0x6af   : > { %v1995_v24 = vpop.xlane.xlu1 %1994 }
 0x6b0   : > { %v2473_v26 = vpop.eup %2472  ;;  %v1997_v9 = vmul.f32 0.007874016, %v1995_v24 }
 0x6b1   : > { %v1999_v27 = vmul.f32 %v2473_v26, %v1996_v37 }
 0x6b2   : > { %2474 = vrsqrt.f32 %v1997_v9  ;;  %vm2017_vm14 = vcmp.eq.f32.partialorder %v1997_v9, inf  ;;  %v2020_v43 = vand.u32 2147483648, %v1997_v9  ;;  %vm2019_vm15 = vcmp.eq.f32.partialorder %v1997_v9, 0.0 }
 0x6b3   : > { %v2000_v59 = vmul.f32 %v2473_v26, %v1999_v27 }
 0x6b5   : > { %v2001_v29 = vmul.f32 0.5, %v2000_v59 }
 0x6b7   : > { %v2002_v32 = vsub.f32 1.5, %v2001_v29 }
 0x6b8   : > { %v2475_v34 = vpop.eup %2474 }
 0x6b9   : > { %v2003_v3 = vmul.f32 %v2473_v26, %v2002_v32  ;;  %v2011_v60 = vmul.f32 %v2475_v34, %v1997_v9 }
 0x6bb   : > { %v2004_v38 = vmul.f32 %v2003_v3, %v1996_v37  ;;  %v2012_v54 = vmul.f32 %v2475_v34, %v2011_v60 }
 0x6bd   : > { %v2006_v33 = vsel %vm2005_vm12, %v1996_v37, %v2004_v38  ;;  %v2013_v22 = vmul.f32 0.5, %v2012_v54 }
 0x6be   : > { %v2009_v39 = vsel %vm2007_vm13, %v2008_v62, %v2006_v33 }
 0x6bf   : > { %v2022_v40 = vadd.f32 1e-06, %v2009_v39  ;;  %v2014_v46 = vsub.f32 1.5, %v2013_v22 }
 0x6c1   : > { %2476 = vrcp.f32 %v2022_v40  ;;  %v2015_v36 = vmul.f32 %v2475_v34, %v2014_v46 }
 0x6c3   : > { %v2016_v42 = vmul.f32 %v2015_v36, %v1997_v9 }
 0x6c5   : > { %v2018_v14 = vsel %vm2017_vm14, %v1997_v9, %v2016_v42 }
 0x6c6   : > { %v2021_v25 = vsel %vm2019_vm15, %v2020_v43, %v2018_v14 }
 0x6c7   : > { %v2477_v41 = vpop.eup %2476  ;;  %v2023_v12 = vadd.f32 1e-06, %v2021_v25 }
 0x6c8   : > { %v2026_v0 = vmul.f32 %v2477_v41, %v1988_v13 }
 0x6c9   : > { %2478 = vrcp.f32 %v2023_v12 }
 0x6ca   : > { %v2031_v48 = vmul.f32 %v2470_v45, %v2026_v0 }
 0x6cc   : > { %v2036_v19 = vadd.f32 %v2471_v31, %v2031_v48 }
 0x6ce   : > { %2038 = vst [vmem:[%s3049_s17] sm:$0xff] %v2036_v19 }
 0x6cf   : > { %v2479_v56 = vpop.eup %2478 }
 0x6d0   : > { %v2027_v5 = vmul.f32 %v2479_v56, %v1989_v17 }
 0x6d2   : > { %v2032_v10 = vmul.f32 %v2470_v45, %v2027_v5 }
 0x6d4   : > { %v2037_v51 = vadd.f32 %v2471_v31, %v2032_v10 }
 0x6d6   : > { %2039 = vst [vmem:[%s3049_s17 + $0x8] sm:$0xff] %v2037_v51 }
 0x6d7 PF: > { %s3756_s11 = sld [smem:[#allocation18_spill]]  ;;  %s2053_s8 = sshll.u32 %s3049_s17, 4  ;;  %s2054_s8 = int_to_ptr.vmem [resolvable:$true] %s2053_s8 }
 0x6d8   : > { %s3758_s2 = sld [smem:[#allocation43_spill]]  ;;  %s3759_s15 = sand.u32 1, %s2694_s25  }
 0x6d9   : > { %s2041_s14 = scalar_lea.sflag [#allocation4], %s3759_s15 }
 0x6dd   : > { %s2290_s27 = sshll.u32 %s3756_s11, 4 }
 0x6de   : > { %s2052_s9 = scalar_lea.hbm %s3758_s2, %s2290_s27  ;;  %s2620_s29 = scalar_lea.hbm %s3758_s2, 32 }
 0x6df   : > { %s2055_s22 = sshll.u32 %s2052_s9, 4  ;;  %s2056_s22 = int_to_ptr.hbm [resolvable:$true] %s2055_s22 }
 0x6e0   : > { %s2614_s13 = sshra.s32 %s2056_s22, 4  ;;  %s2615_s13 = int_to_ptr.hbm [resolvable:$true] %s2614_s13 }
 0x6e1   : > { %s2616_s19 = scalar_lea.hbm %s2615_s13, 16  ;;  %p2621_p8 = scmp.lt.s32.totalorder %s2615_s13, %s3758_s2 }
 0x6e2   : > { %p2617_p4 = scmp.ne.s32.totalorder %s2615_s13, %s2616_s19  ;;  %p2622_p10 = scmp.lt.s32.totalorder %s2620_s29, %s2616_s19 }
 0x6e4   : > { %p2618_p5 = pnand %p2617_p4, %p2903_p7  ;;  %p2623_p12 = por %p2622_p10, %p2621_p8 }
 0x6e6   : > { %p2619_p6 = pneg %p2618_p5 }
 0x6e8   : > { %p2624_p0 = pnand %p2623_p12, %p2619_p6 }
 0x6ea   : > { %2627 = shalt.err (!%p2624_p0)
}
 0x6eb   : > { %s2740_s17 = smov 128   ;;  %s2741_s20 = smov 8  }
 0x6ec   : > { %2303 = dma.vmem_to_hbm [thread:$0]  (%p2903_p7), %s2054_s8, 256, %s2056_s22, %s2041_s14, %s2740_s17, %s2740_s17, %s2741_s20  }
 0x6ed PF: > { %s3760_s10 = sld [smem:[#allocation14_spill]]  ;;  %p2328_p1 = scmp.ge.s32.totalorder %s2730_s1, 2 }
 0x6ef   : > { %p2320_p11 = pnand %p2328_p1, %p2908_p9 }
 0x6f1   : > { %p2321_p3 = pneg %p2320_p11 }
 0x6f3   : > { %s2070_s18 = sand.u32 1, %s3760_s10  }
 0x6f4   : > { %s2071_s21 = scalar_lea.sflag [#allocation4], %s2070_s18 }
 0x6f5   : > { %2685 = dma.done.wait (%p2321_p3), %s2071_s21, 256  }
 0x6f6   : > { %2687 = vsyncadd (%p2321_p3), %s2071_s21, 4294967040  ;;  %s32_s1 = sadd.s32 1, %s2730_s1   ;;  %s3762_s27 = sld [smem:[#allocation15_spill]] }
 0x6f7   : > { %p29_p13 = scmp.ge.s32.totalorder %s32_s1, 6   ;;  %s3763_s28 = sld [smem:[#allocation16_spill]] }
 0x6f8   : > { %s3764_s29 = sld [smem:[#allocation25_spill]]  ;;  %s3769_s24 = smov %s2694_s25 }
 0x6f9   : > { %s3765_s0 = sld [smem:[#allocation19_spill]]  ;;  %s3770_s25 = smov %s2698_s26 }
 0x6fa   : > { %s3766_s30 = sld [smem:[#allocation20_spill]]  ;;  %s3771_s26 = smov %s2962_s12 }
 0x6fb   : > { %s3767_s18 = sld [smem:[#allocation23_spill]]  ;;  %31 = sbr.rel (!%p29_p13) target bundleno = 28 (0x1c), region = 184 }
 0x6fc   : > { %s3768_s19 = sld [smem:[#allocation24_spill]] }
 0x700   :  { %2077 = vsyncpa [#allocation3], 1 }
 0x701   :  { %2079 = vsyncpa [#allocation3 + $0x1], 1 }
 0x702   :  { %2080 = vsyncpa [#allocation6], 1 }
 0x703   :  { %2081 = vsyncpa [#allocation4], 1 }
 0x704   :  { %2083 = vsyncpa [#allocation4 + $0x1], 1 }

</bundles_post_ra>
